<compile_context>
chip_gen: v5e
topology: v5e:2x2
jax: 0.10.0
libtpu: 0.0.40
codegen_flags: <defaults>
</compile_context>

<pallas_src>
import math
import functools

import jax
import jax.numpy as jnp
import numpy as np
from jax.experimental import pallas as pl
from jax.experimental.pallas import tpu as pltpu


def _layernorm(x, gamma, beta, eps=1e-5):
    mu = jnp.mean(x, axis=-1, keepdims=True)
    var = jnp.mean(jnp.square(x - mu), axis=-1, keepdims=True)
    return (x - mu) * jax.lax.rsqrt(var + eps) * gamma + beta


def _transformer_stack_kernel(x_ref, wq_ref, wk_ref, wv_ref, wo3_ref, bo_ref,
                              g1_ref, be1_ref, w1_ref, b1_ref, w2_ref, b2_ref,
                              g2_ref, be2_ref, o_ref, *, n_heads):
    """One transformer block for one batch row; grid axis 1 walks the layers.

    The output block index only depends on the batch index, so o_ref stays
    resident in VMEM across the layer axis and doubles as the running
    activation (read layer l-1's result, write layer l's result)."""
    layer = pl.program_id(1)

    @pl.when(layer == 0)
    def _():
        o_ref[...] = x_ref[...]                       # seed the running activation

    x = o_ref[...]                                    # (S, D) f32, previous layer out
    S, D = x.shape
    dh = D // n_heads
    inv_sqrt_dh = 1.0 / math.sqrt(dh)

    x_bf = x.astype(jnp.bfloat16)
    wq = wq_ref[...]                                  # (dh, dh) bf16, shared across heads
    wk = wk_ref[...]
    wv = wv_ref[...]

    # Multi-head attention.  Static (unrolled) head loop; every op inside is an
    # MXU matmul.  The output projection is accumulated per head (full-width
    # (S, D) adds only -- no concat scratch, no masked partial stores).
    attn = jnp.zeros((S, D), jnp.float32)
    for h in range(n_heads):
        lo = h * dh
        xh = x_bf[:, lo:lo + dh]                      # (S, dh) read-only slice
        q = jnp.dot(xh, wq, preferred_element_type=jnp.float32)   # (S, dh)
        k = jnp.dot(xh, wk, preferred_element_type=jnp.float32)
        v = jnp.dot(xh, wv, preferred_element_type=jnp.float32)

        # scores = q @ k^T -> (S, S), contraction over the head dim on the MXU
        s = jax.lax.dot_general(
            q.astype(jnp.bfloat16), k.astype(jnp.bfloat16),
            (((1,), (1,)), ((), ())),
            preferred_element_type=jnp.float32) * inv_sqrt_dh
        s = s - jnp.max(s, axis=-1, keepdims=True)    # f32 softmax (stable)
        e = jnp.exp(s)
        denom = jnp.sum(e, axis=-1, keepdims=True)
        p = e * pl.reciprocal(denom, approx=True)

        head_out = jnp.dot(p.astype(jnp.bfloat16), v.astype(jnp.bfloat16),
                           preferred_element_type=jnp.float32)     # (S, dh)
        # wo3_ref[h] is the (dh, D) row-block of the output projection.
        attn = attn + jnp.dot(head_out.astype(jnp.bfloat16), wo3_ref[h],
                              preferred_element_type=jnp.float32)  # (S, D)

    attn_out = attn + bo_ref[...]

    # residual with the (pre-projection) value input, then LayerNorm.
    # TODO(synk): dropout layers are identity (eval mode).
    res1 = attn_out + x
    n1 = _layernorm(res1, g1_ref[...], be1_ref[...])

    # feed-forward: Linear -> ReLU -> Linear, residual, LayerNorm
    hmid = jnp.maximum(
        jnp.dot(n1.astype(jnp.bfloat16), w1_ref[...],
                preferred_element_type=jnp.float32) + b1_ref[...], 0.0)
    ff = jnp.dot(hmid.astype(jnp.bfloat16), w2_ref[...],
                 preferred_element_type=jnp.float32) + b2_ref[...]
    res2 = ff + n1
    o_ref[...] = _layernorm(res2, g2_ref[...], be2_ref[...])


def transformer_stack(x, sp, n_heads, *, vmem_limit_bytes=None):
    """Runs all encoder layers in one pallas_call. sp = layer-stacked params."""
    B, S, D = x.shape
    L = sp["wq"].shape[0]
    H = n_heads
    dh = D // H
    F = sp["w1"].shape[-1]
    kern = functools.partial(_transformer_stack_kernel, n_heads=n_heads)

    def wspec(shape):
        # layer-stacked weight: leading layer dim squeezed, fetch block `l`.
        nd = len(shape)
        return pl.BlockSpec((None,) + shape, lambda b, l, nd=nd: (l,) + (0,) * nd)

    cp = dict(dimension_semantics=("parallel", "arbitrary"))
    if vmem_limit_bytes is not None:
        cp["vmem_limit_bytes"] = vmem_limit_bytes

    return pl.pallas_call(
        kern,
        out_shape=jax.ShapeDtypeStruct((B, S, D), jnp.float32),
        grid=(B, L),
        in_specs=[
            pl.BlockSpec((None, S, D), lambda b, l: (b, 0, 0)),   # x (one batch row)
            wspec((dh, dh)), wspec((dh, dh)), wspec((dh, dh)),    # wq, wk, wv (per-head, shared)
            wspec((H, dh, D)), wspec((1, D)),                     # wo (head-blocked), bo
            wspec((1, D)), wspec((1, D)),                         # ln1 gamma, beta
            wspec((D, F)), wspec((1, F)),                         # w1, b1
            wspec((F, D)), wspec((1, D)),                         # w2, b2
            wspec((1, D)), wspec((1, D)),                         # ln2 gamma, beta
        ],
        out_specs=pl.BlockSpec((None, S, D), lambda b, l: (b, 0, 0)),
        compiler_params=pltpu.CompilerParams(**cp),
    )(x, sp["wq"], sp["wk"], sp["wv"], sp["wo3"], sp["bo"],
      sp["ln1_g"], sp["ln1_b"], sp["w1"], sp["b1"], sp["w2"], sp["b2"],
      sp["ln2_g"], sp["ln2_b"])


def make_positional_encoding(max_seq_len, embed_dim):
    # exact formula from the reference PositionalEncoding.__init__
    # (intentionally kept, even though it differs from the standard PE)
    pe = np.zeros((max_seq_len, embed_dim), dtype=np.float32)
    for pos in range(max_seq_len):
        for i in range(0, embed_dim, 2):
            pe[pos, i] = math.sin(pos / 10000 ** (2 * i / embed_dim))
            pe[pos, i + 1] = math.cos(pos / 10000 ** (2 * (i + 1) / embed_dim))
    return jnp.asarray(pe)


def init_params(key, vocab_size, seq_len, embed_dim, num_layers,
                expansion_factor, n_heads):
    dh = embed_dim // n_heads
    ffn = expansion_factor * embed_dim
    k_emb, *k_layers = jax.random.split(key, num_layers + 1)
    layers = []
    for kl in k_layers:
        ks = jax.random.split(kl, 6)
        wo = (jax.random.normal(ks[3], (embed_dim, embed_dim), jnp.float32)
              / math.sqrt(embed_dim))
        layers.append({
            # per-head (dh, dh) weights, shared across heads (as declared in the
            # reference module); matmul weights stored bf16, accumulation in f32.
            "wq": (jax.random.normal(ks[0], (dh, dh), jnp.float32)
                   / math.sqrt(dh)).astype(jnp.bfloat16),
            "wk": (jax.random.normal(ks[1], (dh, dh), jnp.float32)
                   / math.sqrt(dh)).astype(jnp.bfloat16),
            "wv": (jax.random.normal(ks[2], (dh, dh), jnp.float32)
                   / math.sqrt(dh)).astype(jnp.bfloat16),
            # output projection reshaped to (H, dh, D) so the kernel indexes a
            # whole head-row block per head (no sub-lane slicing of weights).
            "wo3": wo.reshape(n_heads, dh, embed_dim).astype(jnp.bfloat16),
            "bo": jnp.zeros((1, embed_dim), jnp.float32),
            "ln1_g": jnp.ones((1, embed_dim), jnp.float32),
            "ln1_b": jnp.zeros((1, embed_dim), jnp.float32),
            "w1": (jax.random.normal(ks[4], (embed_dim, ffn), jnp.float32)
                   / math.sqrt(embed_dim)).astype(jnp.bfloat16),
            "b1": jnp.zeros((1, ffn), jnp.float32),
            "w2": (jax.random.normal(ks[5], (ffn, embed_dim), jnp.float32)
                   / math.sqrt(ffn)).astype(jnp.bfloat16),
            "b2": jnp.zeros((1, embed_dim), jnp.float32),
            "ln2_g": jnp.ones((1, embed_dim), jnp.float32),
            "ln2_b": jnp.zeros((1, embed_dim), jnp.float32),
        })
    # Stack per-layer params along a leading layer axis so all layers run inside
    # one pallas_call (layer grid axis -> weight DMAs overlap compute).
    stacked = {k: jnp.stack([lp[k] for lp in layers], axis=0) for k in layers[0]}
    return {
        "embedding": jax.random.normal(k_emb, (vocab_size, embed_dim), jnp.float32),
        "pe": make_positional_encoding(seq_len, embed_dim),
        "stacked": stacked,
    }


def transformer_encoder(tokens, params, n_heads, *, vmem_limit_bytes=None):
    # Embedding gather + positional encoding are cheap glue; the transformer
    # blocks (the hot path) run as one Pallas kernel over (batch, layer).
    emb = params["embedding"][tokens]                          # (B, S, D)
    S = tokens.shape[1]
    D = emb.shape[-1]
    x = emb * math.sqrt(D) + params["pe"][None, :S, :]
    return transformer_stack(x, params["stacked"], n_heads,
                             vmem_limit_bytes=vmem_limit_bytes)


if __name__ == "__main__":
    B, S = 2, 8
    vocab_size, embed_dim = 50, 32
    n_heads, num_layers, expansion_factor = 8, 2, 4

    key = jax.random.PRNGKey(0)
    k_tok, k_par = jax.random.split(key)
    tokens = jax.random.randint(k_tok, (B, S), 0, vocab_size, dtype=jnp.int32)
    params = init_params(k_par, vocab_size, S, embed_dim, num_layers,
                         expansion_factor, n_heads)

    out = transformer_encoder(tokens, params, n_heads)
    out = jax.block_until_ready(out)
    assert out.shape == (B, S, embed_dim), out.shape
    assert bool(jnp.all(jnp.isfinite(out)))
    print("KERNEL_OK")
</pallas_src>

<mosaic_0001>
module attributes {stable_mosaic.version = 11 : i64} {
  func.func @_transformer_stack_kernel(%arg0: i32, %arg1: i32, %arg2: memref<1x8x32xf32, #tpu.memory_space<vmem>>, %arg3: memref<1x4x4xbf16, #tpu.memory_space<vmem>>, %arg4: memref<1x4x4xbf16, #tpu.memory_space<vmem>>, %arg5: memref<1x4x4xbf16, #tpu.memory_space<vmem>>, %arg6: memref<1x8x4x32xbf16, #tpu.memory_space<vmem>>, %arg7: memref<1x1x32xf32, #tpu.memory_space<vmem>>, %arg8: memref<1x1x32xf32, #tpu.memory_space<vmem>>, %arg9: memref<1x1x32xf32, #tpu.memory_space<vmem>>, %arg10: memref<1x32x128xbf16, #tpu.memory_space<vmem>>, %arg11: memref<1x1x128xf32, #tpu.memory_space<vmem>>, %arg12: memref<1x128x32xbf16, #tpu.memory_space<vmem>>, %arg13: memref<1x1x32xf32, #tpu.memory_space<vmem>>, %arg14: memref<1x1x32xf32, #tpu.memory_space<vmem>>, %arg15: memref<1x1x32xf32, #tpu.memory_space<vmem>>, %arg16: memref<1x8x32xf32, #tpu.memory_space<vmem>>) attributes {dimension_semantics = [#tpu.dimension_semantics<parallel>, #tpu.dimension_semantics<arbitrary>], iteration_bounds = array<i64: 2, 2>, scalar_prefetch = 0 : i64, scratch_operands = 0 : i64, tpu.core_type = #tpu.core_type<tc>, window_params = [{transform_indices = @transform_0, window_bounds = array<i64: 1, 8, 32>}, {transform_indices = @transform_1, window_bounds = array<i64: 1, 4, 4>}, {transform_indices = @transform_2, window_bounds = array<i64: 1, 4, 4>}, {transform_indices = @transform_3, window_bounds = array<i64: 1, 4, 4>}, {transform_indices = @transform_4, window_bounds = array<i64: 1, 8, 4, 32>}, {transform_indices = @transform_5, window_bounds = array<i64: 1, 1, 32>}, {transform_indices = @transform_6, window_bounds = array<i64: 1, 1, 32>}, {transform_indices = @transform_7, window_bounds = array<i64: 1, 1, 32>}, {transform_indices = @transform_8, window_bounds = array<i64: 1, 32, 128>}, {transform_indices = @transform_9, window_bounds = array<i64: 1, 1, 128>}, {transform_indices = @transform_10, window_bounds = array<i64: 1, 128, 32>}, {transform_indices = @transform_11, window_bounds = array<i64: 1, 1, 32>}, {transform_indices = @transform_12, window_bounds = array<i64: 1, 1, 32>}, {transform_indices = @transform_13, window_bounds = array<i64: 1, 1, 32>}, {transform_indices = @transform_14, window_bounds = array<i64: 1, 8, 32>}]} {
    %c0_i32 = arith.constant 0 : i32
    %0 = arith.cmpi eq, %arg1, %c0_i32 : i32
    %1 = arith.extui %0 : i1 to i32
    %c0_i32_0 = arith.constant 0 : i32
    %2 = arith.cmpi ne, %1, %c0_i32_0 : i32
    scf.if %2 {
      %c0_152 = arith.constant 0 : index
      %c0_153 = arith.constant 0 : index
      %c0_154 = arith.constant 0 : index
      %308 = vector.load %arg2[%c0_152, %c0_153, %c0_154] : memref<1x8x32xf32, #tpu.memory_space<vmem>>, vector<1x8x32xf32>
      %309 = vector.shape_cast %308 : vector<1x8x32xf32> to vector<8x32xf32>
      %c0_155 = arith.constant 0 : index
      %c0_156 = arith.constant 0 : index
      %c0_157 = arith.constant 0 : index
      %310 = vector.load %arg16[%c0_155, %c0_156, %c0_157] : memref<1x8x32xf32, #tpu.memory_space<vmem>>, vector<1x8x32xf32>
      %311 = vector.shape_cast %310 : vector<1x8x32xf32> to vector<8x32xf32>
      %312 = vector.shape_cast %309 : vector<8x32xf32> to vector<1x8x32xf32>
      tpu.vector_store %arg16[%c0_155, %c0_156, %c0_157], %312 {strides = array<i32>} : memref<1x8x32xf32, #tpu.memory_space<vmem>>, vector<1x8x32xf32>,
    } else {
    }
    %c0 = arith.constant 0 : index
    %c0_1 = arith.constant 0 : index
    %c0_2 = arith.constant 0 : index
    %3 = vector.load %arg16[%c0, %c0_1, %c0_2] : memref<1x8x32xf32, #tpu.memory_space<vmem>>, vector<1x8x32xf32>
    %4 = vector.shape_cast %3 : vector<1x8x32xf32> to vector<8x32xf32>
    %5 = arith.truncf %4 : vector<8x32xf32> to vector<8x32xbf16>
    %c0_3 = arith.constant 0 : index
    %c0_4 = arith.constant 0 : index
    %c0_5 = arith.constant 0 : index
    %6 = vector.load %arg3[%c0_3, %c0_4, %c0_5] : memref<1x4x4xbf16, #tpu.memory_space<vmem>>, vector<1x4x4xbf16>
    %7 = vector.shape_cast %6 : vector<1x4x4xbf16> to vector<4x4xbf16>
    %c0_6 = arith.constant 0 : index
    %c0_7 = arith.constant 0 : index
    %c0_8 = arith.constant 0 : index
    %8 = vector.load %arg4[%c0_6, %c0_7, %c0_8] : memref<1x4x4xbf16, #tpu.memory_space<vmem>>, vector<1x4x4xbf16>
    %9 = vector.shape_cast %8 : vector<1x4x4xbf16> to vector<4x4xbf16>
    %c0_9 = arith.constant 0 : index
    %c0_10 = arith.constant 0 : index
    %c0_11 = arith.constant 0 : index
    %10 = vector.load %arg5[%c0_9, %c0_10, %c0_11] : memref<1x4x4xbf16, #tpu.memory_space<vmem>>, vector<1x4x4xbf16>
    %11 = vector.shape_cast %10 : vector<1x4x4xbf16> to vector<4x4xbf16>
    %cst = arith.constant 0.000000e+00 : f32
    %12 = vector.broadcast %cst : f32 to vector<8x32xf32>
    %13 = vector.extract_strided_slice %5 {offsets = [0, 0], sizes = [8, 4], strides = [1, 1]} : vector<8x32xbf16> to vector<8x4xbf16>
    %cst_12 = arith.constant dense<0.000000e+00> : vector<8x4xf32>
    %14 = tpu.matmul %13, %7, %cst_12 {dimension_numbers = #tpu.dot_dimension_numbers<[1], [0], [0], [1], [0, 0, 1, 1], [], []>} : vector<8x4xbf16>, vector<4x4xbf16>, vector<8x4xf32> -> vector<8x4xf32>
    %cst_13 = arith.constant dense<0.000000e+00> : vector<8x4xf32>
    %15 = tpu.matmul %13, %9, %cst_13 {dimension_numbers = #tpu.dot_dimension_numbers<[1], [0], [0], [1], [0, 0, 1, 1], [], []>} : vector<8x4xbf16>, vector<4x4xbf16>, vector<8x4xf32> -> vector<8x4xf32>
    %cst_14 = arith.constant dense<0.000000e+00> : vector<8x4xf32>
    %16 = tpu.matmul %13, %11, %cst_14 {dimension_numbers = #tpu.dot_dimension_numbers<[1], [0], [0], [1], [0, 0, 1, 1], [], []>} : vector<8x4xbf16>, vector<4x4xbf16>, vector<8x4xf32> -> vector<8x4xf32>
    %17 = arith.truncf %14 : vector<8x4xf32> to vector<8x4xbf16>
    %18 = arith.truncf %15 : vector<8x4xf32> to vector<8x4xbf16>
    %cst_15 = arith.constant dense<0.000000e+00> : vector<8x8xf32>
    %19 = tpu.matmul %17, %18, %cst_15 {dimension_numbers = #tpu.dot_dimension_numbers<[1], [1], [0], [0], [0, 0, 1, 0], [], []>} : vector<8x4xbf16>, vector<8x4xbf16>, vector<8x8xf32> -> vector<8x8xf32>
    %cst_16 = arith.constant 5.000000e-01 : f32
    %20 = vector.broadcast %cst_16 : f32 to vector<8x8xf32>
    %21 = arith.mulf %19, %20 : vector<8x8xf32>
    %cst_17 = arith.constant dense<0xFF800000> : vector<8xf32>
    %22 = vector.multi_reduction <maximumf>, %21, %cst_17 [1] : vector<8x8xf32> to vector<8xf32>
    %23 = vector.shape_cast %22 : vector<8xf32> to vector<8x1xf32>
    %24 = vector.broadcast %23 : vector<8x1xf32> to vector<8x8xf32>
    %25 = arith.subf %21, %24 : vector<8x8xf32>
    %26 = math.exp %25 : vector<8x8xf32>
    %cst_18 = arith.constant dense<0.000000e+00> : vector<8xf32>
    %27 = vector.multi_reduction <add>, %26, %cst_18 [1] : vector<8x8xf32> to vector<8xf32>
    %28 = vector.shape_cast %27 : vector<8xf32> to vector<8x1xf32>
    %29 = tpu.reciprocal %28 {approx = true} : vector<8x1xf32> -> vector<8x1xf32>
    %30 = vector.broadcast %29 : vector<8x1xf32> to vector<8x8xf32>
    %31 = arith.mulf %26, %30 : vector<8x8xf32>
    %32 = arith.truncf %31 : vector<8x8xf32> to vector<8x8xbf16>
    %33 = arith.truncf %16 : vector<8x4xf32> to vector<8x4xbf16>
    %cst_19 = arith.constant dense<0.000000e+00> : vector<8x4xf32>
    %34 = tpu.matmul %32, %33, %cst_19 {dimension_numbers = #tpu.dot_dimension_numbers<[1], [0], [0], [1], [0, 0, 1, 1], [], []>} : vector<8x8xbf16>, vector<8x4xbf16>, vector<8x4xf32> -> vector<8x4xf32>
    %35 = arith.truncf %34 : vector<8x4xf32> to vector<8x4xbf16>
    %c0_20 = arith.constant 0 : index
    %c0_21 = arith.constant 0 : index
    %c0_22 = arith.constant 0 : index
    %c0_23 = arith.constant 0 : index
    %36 = vector.load %arg6[%c0_20, %c0_21, %c0_22, %c0_23] : memref<1x8x4x32xbf16, #tpu.memory_space<vmem>>, vector<1x1x4x32xbf16>
    %37 = vector.shape_cast %36 : vector<1x1x4x32xbf16> to vector<4x32xbf16>
    %cst_24 = arith.constant dense<0.000000e+00> : vector<8x32xf32>
    %38 = tpu.matmul %35, %37, %cst_24 {dimension_numbers = #tpu.dot_dimension_numbers<[1], [0], [0], [1], [0, 0, 1, 1], [], []>} : vector<8x4xbf16>, vector<4x32xbf16>, vector<8x32xf32> -> vector<8x32xf32>
    %39 = arith.addf %12, %38 : vector<8x32xf32>
    %40 = vector.extract_strided_slice %5 {offsets = [0, 4], sizes = [8, 4], strides = [1, 1]} : vector<8x32xbf16> to vector<8x4xbf16>
    %cst_25 = arith.constant dense<0.000000e+00> : vector<8x4xf32>
    %41 = tpu.matmul %40, %7, %cst_25 {dimension_numbers = #tpu.dot_dimension_numbers<[1], [0], [0], [1], [0, 0, 1, 1], [], []>} : vector<8x4xbf16>, vector<4x4xbf16>, vector<8x4xf32> -> vector<8x4xf32>
    %cst_26 = arith.constant dense<0.000000e+00> : vector<8x4xf32>
    %42 = tpu.matmul %40, %9, %cst_26 {dimension_numbers = #tpu.dot_dimension_numbers<[1], [0], [0], [1], [0, 0, 1, 1], [], []>} : vector<8x4xbf16>, vector<4x4xbf16>, vector<8x4xf32> -> vector<8x4xf32>
    %cst_27 = arith.constant dense<0.000000e+00> : vector<8x4xf32>
    %43 = tpu.matmul %40, %11, %cst_27 {dimension_numbers = #tpu.dot_dimension_numbers<[1], [0], [0], [1], [0, 0, 1, 1], [], []>} : vector<8x4xbf16>, vector<4x4xbf16>, vector<8x4xf32> -> vector<8x4xf32>
    %44 = arith.truncf %41 : vector<8x4xf32> to vector<8x4xbf16>
    %45 = arith.truncf %42 : vector<8x4xf32> to vector<8x4xbf16>
    %cst_28 = arith.constant dense<0.000000e+00> : vector<8x8xf32>
    %46 = tpu.matmul %44, %45, %cst_28 {dimension_numbers = #tpu.dot_dimension_numbers<[1], [1], [0], [0], [0, 0, 1, 0], [], []>} : vector<8x4xbf16>, vector<8x4xbf16>, vector<8x8xf32> -> vector<8x8xf32>
    %cst_29 = arith.constant 5.000000e-01 : f32
    %47 = vector.broadcast %cst_29 : f32 to vector<8x8xf32>
    %48 = arith.mulf %46, %47 : vector<8x8xf32>
    %cst_30 = arith.constant dense<0xFF800000> : vector<8xf32>
    %49 = vector.multi_reduction <maximumf>, %48, %cst_30 [1] : vector<8x8xf32> to vector<8xf32>
    %50 = vector.shape_cast %49 : vector<8xf32> to vector<8x1xf32>
    %51 = vector.broadcast %50 : vector<8x1xf32> to vector<8x8xf32>
    %52 = arith.subf %48, %51 : vector<8x8xf32>
    %53 = math.exp %52 : vector<8x8xf32>
    %cst_31 = arith.constant dense<0.000000e+00> : vector<8xf32>
    %54 = vector.multi_reduction <add>, %53, %cst_31 [1] : vector<8x8xf32> to vector<8xf32>
    %55 = vector.shape_cast %54 : vector<8xf32> to vector<8x1xf32>
    %56 = tpu.reciprocal %55 {approx = true} : vector<8x1xf32> -> vector<8x1xf32>
    %57 = vector.broadcast %56 : vector<8x1xf32> to vector<8x8xf32>
    %58 = arith.mulf %53, %57 : vector<8x8xf32>
    %59 = arith.truncf %58 : vector<8x8xf32> to vector<8x8xbf16>
    %60 = arith.truncf %43 : vector<8x4xf32> to vector<8x4xbf16>
    %cst_32 = arith.constant dense<0.000000e+00> : vector<8x4xf32>
    %61 = tpu.matmul %59, %60, %cst_32 {dimension_numbers = #tpu.dot_dimension_numbers<[1], [0], [0], [1], [0, 0, 1, 1], [], []>} : vector<8x8xbf16>, vector<8x4xbf16>, vector<8x4xf32> -> vector<8x4xf32>
    %62 = arith.truncf %61 : vector<8x4xf32> to vector<8x4xbf16>
    %c0_33 = arith.constant 0 : index
    %c1 = arith.constant 1 : index
    %c0_34 = arith.constant 0 : index
    %c0_35 = arith.constant 0 : index
    %63 = vector.load %arg6[%c0_33, %c1, %c0_34, %c0_35] : memref<1x8x4x32xbf16, #tpu.memory_space<vmem>>, vector<1x1x4x32xbf16>
    %64 = vector.shape_cast %63 : vector<1x1x4x32xbf16> to vector<4x32xbf16>
    %cst_36 = arith.constant dense<0.000000e+00> : vector<8x32xf32>
    %65 = tpu.matmul %62, %64, %cst_36 {dimension_numbers = #tpu.dot_dimension_numbers<[1], [0], [0], [1], [0, 0, 1, 1], [], []>} : vector<8x4xbf16>, vector<4x32xbf16>, vector<8x32xf32> -> vector<8x32xf32>
    %66 = arith.addf %39, %65 : vector<8x32xf32>
    %67 = vector.extract_strided_slice %5 {offsets = [0, 8], sizes = [8, 4], strides = [1, 1]} : vector<8x32xbf16> to vector<8x4xbf16>
    %cst_37 = arith.constant dense<0.000000e+00> : vector<8x4xf32>
    %68 = tpu.matmul %67, %7, %cst_37 {dimension_numbers = #tpu.dot_dimension_numbers<[1], [0], [0], [1], [0, 0, 1, 1], [], []>} : vector<8x4xbf16>, vector<4x4xbf16>, vector<8x4xf32> -> vector<8x4xf32>
    %cst_38 = arith.constant dense<0.000000e+00> : vector<8x4xf32>
    %69 = tpu.matmul %67, %9, %cst_38 {dimension_numbers = #tpu.dot_dimension_numbers<[1], [0], [0], [1], [0, 0, 1, 1], [], []>} : vector<8x4xbf16>, vector<4x4xbf16>, vector<8x4xf32> -> vector<8x4xf32>
    %cst_39 = arith.constant dense<0.000000e+00> : vector<8x4xf32>
    %70 = tpu.matmul %67, %11, %cst_39 {dimension_numbers = #tpu.dot_dimension_numbers<[1], [0], [0], [1], [0, 0, 1, 1], [], []>} : vector<8x4xbf16>, vector<4x4xbf16>, vector<8x4xf32> -> vector<8x4xf32>
    %71 = arith.truncf %68 : vector<8x4xf32> to vector<8x4xbf16>
    %72 = arith.truncf %69 : vector<8x4xf32> to vector<8x4xbf16>
    %cst_40 = arith.constant dense<0.000000e+00> : vector<8x8xf32>
    %73 = tpu.matmul %71, %72, %cst_40 {dimension_numbers = #tpu.dot_dimension_numbers<[1], [1], [0], [0], [0, 0, 1, 0], [], []>} : vector<8x4xbf16>, vector<8x4xbf16>, vector<8x8xf32> -> vector<8x8xf32>
    %cst_41 = arith.constant 5.000000e-01 : f32
    %74 = vector.broadcast %cst_41 : f32 to vector<8x8xf32>
    %75 = arith.mulf %73, %74 : vector<8x8xf32>
    %cst_42 = arith.constant dense<0xFF800000> : vector<8xf32>
    %76 = vector.multi_reduction <maximumf>, %75, %cst_42 [1] : vector<8x8xf32> to vector<8xf32>
    %77 = vector.shape_cast %76 : vector<8xf32> to vector<8x1xf32>
    %78 = vector.broadcast %77 : vector<8x1xf32> to vector<8x8xf32>
    %79 = arith.subf %75, %78 : vector<8x8xf32>
    %80 = math.exp %79 : vector<8x8xf32>
    %cst_43 = arith.constant dense<0.000000e+00> : vector<8xf32>
    %81 = vector.multi_reduction <add>, %80, %cst_43 [1] : vector<8x8xf32> to vector<8xf32>
    %82 = vector.shape_cast %81 : vector<8xf32> to vector<8x1xf32>
    %83 = tpu.reciprocal %82 {approx = true} : vector<8x1xf32> -> vector<8x1xf32>
    %84 = vector.broadcast %83 : vector<8x1xf32> to vector<8x8xf32>
    %85 = arith.mulf %80, %84 : vector<8x8xf32>
    %86 = arith.truncf %85 : vector<8x8xf32> to vector<8x8xbf16>
    %87 = arith.truncf %70 : vector<8x4xf32> to vector<8x4xbf16>
    %cst_44 = arith.constant dense<0.000000e+00> : vector<8x4xf32>
    %88 = tpu.matmul %86, %87, %cst_44 {dimension_numbers = #tpu.dot_dimension_numbers<[1], [0], [0], [1], [0, 0, 1, 1], [], []>} : vector<8x8xbf16>, vector<8x4xbf16>, vector<8x4xf32> -> vector<8x4xf32>
    %89 = arith.truncf %88 : vector<8x4xf32> to vector<8x4xbf16>
    %c0_45 = arith.constant 0 : index
    %c2 = arith.constant 2 : index
    %c0_46 = arith.constant 0 : index
    %c0_47 = arith.constant 0 : index
    %90 = vector.load %arg6[%c0_45, %c2, %c0_46, %c0_47] : memref<1x8x4x32xbf16, #tpu.memory_space<vmem>>, vector<1x1x4x32xbf16>
    %91 = vector.shape_cast %90 : vector<1x1x4x32xbf16> to vector<4x32xbf16>
    %cst_48 = arith.constant dense<0.000000e+00> : vector<8x32xf32>
    %92 = tpu.matmul %89, %91, %cst_48 {dimension_numbers = #tpu.dot_dimension_numbers<[1], [0], [0], [1], [0, 0, 1, 1], [], []>} : vector<8x4xbf16>, vector<4x32xbf16>, vector<8x32xf32> -> vector<8x32xf32>
    %93 = arith.addf %66, %92 : vector<8x32xf32>
    %94 = vector.extract_strided_slice %5 {offsets = [0, 12], sizes = [8, 4], strides = [1, 1]} : vector<8x32xbf16> to vector<8x4xbf16>
    %cst_49 = arith.constant dense<0.000000e+00> : vector<8x4xf32>
    %95 = tpu.matmul %94, %7, %cst_49 {dimension_numbers = #tpu.dot_dimension_numbers<[1], [0], [0], [1], [0, 0, 1, 1], [], []>} : vector<8x4xbf16>, vector<4x4xbf16>, vector<8x4xf32> -> vector<8x4xf32>
    %cst_50 = arith.constant dense<0.000000e+00> : vector<8x4xf32>
    %96 = tpu.matmul %94, %9, %cst_50 {dimension_numbers = #tpu.dot_dimension_numbers<[1], [0], [0], [1], [0, 0, 1, 1], [], []>} : vector<8x4xbf16>, vector<4x4xbf16>, vector<8x4xf32> -> vector<8x4xf32>
    %cst_51 = arith.constant dense<0.000000e+00> : vector<8x4xf32>
    %97 = tpu.matmul %94, %11, %cst_51 {dimension_numbers = #tpu.dot_dimension_numbers<[1], [0], [0], [1], [0, 0, 1, 1], [], []>} : vector<8x4xbf16>, vector<4x4xbf16>, vector<8x4xf32> -> vector<8x4xf32>
    %98 = arith.truncf %95 : vector<8x4xf32> to vector<8x4xbf16>
    %99 = arith.truncf %96 : vector<8x4xf32> to vector<8x4xbf16>
    %cst_52 = arith.constant dense<0.000000e+00> : vector<8x8xf32>
    %100 = tpu.matmul %98, %99, %cst_52 {dimension_numbers = #tpu.dot_dimension_numbers<[1], [1], [0], [0], [0, 0, 1, 0], [], []>} : vector<8x4xbf16>, vector<8x4xbf16>, vector<8x8xf32> -> vector<8x8xf32>
    %cst_53 = arith.constant 5.000000e-01 : f32
    %101 = vector.broadcast %cst_53 : f32 to vector<8x8xf32>
    %102 = arith.mulf %100, %101 : vector<8x8xf32>
    %cst_54 = arith.constant dense<0xFF800000> : vector<8xf32>
    %103 = vector.multi_reduction <maximumf>, %102, %cst_54 [1] : vector<8x8xf32> to vector<8xf32>
    %104 = vector.shape_cast %103 : vector<8xf32> to vector<8x1xf32>
    %105 = vector.broadcast %104 : vector<8x1xf32> to vector<8x8xf32>
    %106 = arith.subf %102, %105 : vector<8x8xf32>
    %107 = math.exp %106 : vector<8x8xf32>
    %cst_55 = arith.constant dense<0.000000e+00> : vector<8xf32>
    %108 = vector.multi_reduction <add>, %107, %cst_55 [1] : vector<8x8xf32> to vector<8xf32>
    %109 = vector.shape_cast %108 : vector<8xf32> to vector<8x1xf32>
    %110 = tpu.reciprocal %109 {approx = true} : vector<8x1xf32> -> vector<8x1xf32>
    %111 = vector.broadcast %110 : vector<8x1xf32> to vector<8x8xf32>
    %112 = arith.mulf %107, %111 : vector<8x8xf32>
    %113 = arith.truncf %112 : vector<8x8xf32> to vector<8x8xbf16>
    %114 = arith.truncf %97 : vector<8x4xf32> to vector<8x4xbf16>
    %cst_56 = arith.constant dense<0.000000e+00> : vector<8x4xf32>
    %115 = tpu.matmul %113, %114, %cst_56 {dimension_numbers = #tpu.dot_dimension_numbers<[1], [0], [0], [1], [0, 0, 1, 1], [], []>} : vector<8x8xbf16>, vector<8x4xbf16>, vector<8x4xf32> -> vector<8x4xf32>
    %116 = arith.truncf %115 : vector<8x4xf32> to vector<8x4xbf16>
    %c0_57 = arith.constant 0 : index
    %c3 = arith.constant 3 : index
    %c0_58 = arith.constant 0 : index
    %c0_59 = arith.constant 0 : index
    %117 = vector.load %arg6[%c0_57, %c3, %c0_58, %c0_59] : memref<1x8x4x32xbf16, #tpu.memory_space<vmem>>, vector<1x1x4x32xbf16>
    %118 = vector.shape_cast %117 : vector<1x1x4x32xbf16> to vector<4x32xbf16>
    %cst_60 = arith.constant dense<0.000000e+00> : vector<8x32xf32>
    %119 = tpu.matmul %116, %118, %cst_60 {dimension_numbers = #tpu.dot_dimension_numbers<[1], [0], [0], [1], [0, 0, 1, 1], [], []>} : vector<8x4xbf16>, vector<4x32xbf16>, vector<8x32xf32> -> vector<8x32xf32>
    %120 = arith.addf %93, %119 : vector<8x32xf32>
    %121 = vector.extract_strided_slice %5 {offsets = [0, 16], sizes = [8, 4], strides = [1, 1]} : vector<8x32xbf16> to vector<8x4xbf16>
    %cst_61 = arith.constant dense<0.000000e+00> : vector<8x4xf32>
    %122 = tpu.matmul %121, %7, %cst_61 {dimension_numbers = #tpu.dot_dimension_numbers<[1], [0], [0], [1], [0, 0, 1, 1], [], []>} : vector<8x4xbf16>, vector<4x4xbf16>, vector<8x4xf32> -> vector<8x4xf32>
    %cst_62 = arith.constant dense<0.000000e+00> : vector<8x4xf32>
    %123 = tpu.matmul %121, %9, %cst_62 {dimension_numbers = #tpu.dot_dimension_numbers<[1], [0], [0], [1], [0, 0, 1, 1], [], []>} : vector<8x4xbf16>, vector<4x4xbf16>, vector<8x4xf32> -> vector<8x4xf32>
    %cst_63 = arith.constant dense<0.000000e+00> : vector<8x4xf32>
    %124 = tpu.matmul %121, %11, %cst_63 {dimension_numbers = #tpu.dot_dimension_numbers<[1], [0], [0], [1], [0, 0, 1, 1], [], []>} : vector<8x4xbf16>, vector<4x4xbf16>, vector<8x4xf32> -> vector<8x4xf32>
    %125 = arith.truncf %122 : vector<8x4xf32> to vector<8x4xbf16>
    %126 = arith.truncf %123 : vector<8x4xf32> to vector<8x4xbf16>
    %cst_64 = arith.constant dense<0.000000e+00> : vector<8x8xf32>
    %127 = tpu.matmul %125, %126, %cst_64 {dimension_numbers = #tpu.dot_dimension_numbers<[1], [1], [0], [0], [0, 0, 1, 0], [], []>} : vector<8x4xbf16>, vector<8x4xbf16>, vector<8x8xf32> -> vector<8x8xf32>
    %cst_65 = arith.constant 5.000000e-01 : f32
    %128 = vector.broadcast %cst_65 : f32 to vector<8x8xf32>
    %129 = arith.mulf %127, %128 : vector<8x8xf32>
    %cst_66 = arith.constant dense<0xFF800000> : vector<8xf32>
    %130 = vector.multi_reduction <maximumf>, %129, %cst_66 [1] : vector<8x8xf32> to vector<8xf32>
    %131 = vector.shape_cast %130 : vector<8xf32> to vector<8x1xf32>
    %132 = vector.broadcast %131 : vector<8x1xf32> to vector<8x8xf32>
    %133 = arith.subf %129, %132 : vector<8x8xf32>
    %134 = math.exp %133 : vector<8x8xf32>
    %cst_67 = arith.constant dense<0.000000e+00> : vector<8xf32>
    %135 = vector.multi_reduction <add>, %134, %cst_67 [1] : vector<8x8xf32> to vector<8xf32>
    %136 = vector.shape_cast %135 : vector<8xf32> to vector<8x1xf32>
    %137 = tpu.reciprocal %136 {approx = true} : vector<8x1xf32> -> vector<8x1xf32>
    %138 = vector.broadcast %137 : vector<8x1xf32> to vector<8x8xf32>
    %139 = arith.mulf %134, %138 : vector<8x8xf32>
    %140 = arith.truncf %139 : vector<8x8xf32> to vector<8x8xbf16>
    %141 = arith.truncf %124 : vector<8x4xf32> to vector<8x4xbf16>
    %cst_68 = arith.constant dense<0.000000e+00> : vector<8x4xf32>
    %142 = tpu.matmul %140, %141, %cst_68 {dimension_numbers = #tpu.dot_dimension_numbers<[1], [0], [0], [1], [0, 0, 1, 1], [], []>} : vector<8x8xbf16>, vector<8x4xbf16>, vector<8x4xf32> -> vector<8x4xf32>
    %143 = arith.truncf %142 : vector<8x4xf32> to vector<8x4xbf16>
    %c0_69 = arith.constant 0 : index
    %c4 = arith.constant 4 : index
    %c0_70 = arith.constant 0 : index
    %c0_71 = arith.constant 0 : index
    %144 = vector.load %arg6[%c0_69, %c4, %c0_70, %c0_71] : memref<1x8x4x32xbf16, #tpu.memory_space<vmem>>, vector<1x1x4x32xbf16>
    %145 = vector.shape_cast %144 : vector<1x1x4x32xbf16> to vector<4x32xbf16>
    %cst_72 = arith.constant dense<0.000000e+00> : vector<8x32xf32>
    %146 = tpu.matmul %143, %145, %cst_72 {dimension_numbers = #tpu.dot_dimension_numbers<[1], [0], [0], [1], [0, 0, 1, 1], [], []>} : vector<8x4xbf16>, vector<4x32xbf16>, vector<8x32xf32> -> vector<8x32xf32>
    %147 = arith.addf %120, %146 : vector<8x32xf32>
    %148 = vector.extract_strided_slice %5 {offsets = [0, 20], sizes = [8, 4], strides = [1, 1]} : vector<8x32xbf16> to vector<8x4xbf16>
    %cst_73 = arith.constant dense<0.000000e+00> : vector<8x4xf32>
    %149 = tpu.matmul %148, %7, %cst_73 {dimension_numbers = #tpu.dot_dimension_numbers<[1], [0], [0], [1], [0, 0, 1, 1], [], []>} : vector<8x4xbf16>, vector<4x4xbf16>, vector<8x4xf32> -> vector<8x4xf32>
    %cst_74 = arith.constant dense<0.000000e+00> : vector<8x4xf32>
    %150 = tpu.matmul %148, %9, %cst_74 {dimension_numbers = #tpu.dot_dimension_numbers<[1], [0], [0], [1], [0, 0, 1, 1], [], []>} : vector<8x4xbf16>, vector<4x4xbf16>, vector<8x4xf32> -> vector<8x4xf32>
    %cst_75 = arith.constant dense<0.000000e+00> : vector<8x4xf32>
    %151 = tpu.matmul %148, %11, %cst_75 {dimension_numbers = #tpu.dot_dimension_numbers<[1], [0], [0], [1], [0, 0, 1, 1], [], []>} : vector<8x4xbf16>, vector<4x4xbf16>, vector<8x4xf32> -> vector<8x4xf32>
    %152 = arith.truncf %149 : vector<8x4xf32> to vector<8x4xbf16>
    %153 = arith.truncf %150 : vector<8x4xf32> to vector<8x4xbf16>
    %cst_76 = arith.constant dense<0.000000e+00> : vector<8x8xf32>
    %154 = tpu.matmul %152, %153, %cst_76 {dimension_numbers = #tpu.dot_dimension_numbers<[1], [1], [0], [0], [0, 0, 1, 0], [], []>} : vector<8x4xbf16>, vector<8x4xbf16>, vector<8x8xf32> -> vector<8x8xf32>
    %cst_77 = arith.constant 5.000000e-01 : f32
    %155 = vector.broadcast %cst_77 : f32 to vector<8x8xf32>
    %156 = arith.mulf %154, %155 : vector<8x8xf32>
    %cst_78 = arith.constant dense<0xFF800000> : vector<8xf32>
    %157 = vector.multi_reduction <maximumf>, %156, %cst_78 [1] : vector<8x8xf32> to vector<8xf32>
    %158 = vector.shape_cast %157 : vector<8xf32> to vector<8x1xf32>
    %159 = vector.broadcast %158 : vector<8x1xf32> to vector<8x8xf32>
    %160 = arith.subf %156, %159 : vector<8x8xf32>
    %161 = math.exp %160 : vector<8x8xf32>
    %cst_79 = arith.constant dense<0.000000e+00> : vector<8xf32>
    %162 = vector.multi_reduction <add>, %161, %cst_79 [1] : vector<8x8xf32> to vector<8xf32>
    %163 = vector.shape_cast %162 : vector<8xf32> to vector<8x1xf32>
    %164 = tpu.reciprocal %163 {approx = true} : vector<8x1xf32> -> vector<8x1xf32>
    %165 = vector.broadcast %164 : vector<8x1xf32> to vector<8x8xf32>
    %166 = arith.mulf %161, %165 : vector<8x8xf32>
    %167 = arith.truncf %166 : vector<8x8xf32> to vector<8x8xbf16>
    %168 = arith.truncf %151 : vector<8x4xf32> to vector<8x4xbf16>
    %cst_80 = arith.constant dense<0.000000e+00> : vector<8x4xf32>
    %169 = tpu.matmul %167, %168, %cst_80 {dimension_numbers = #tpu.dot_dimension_numbers<[1], [0], [0], [1], [0, 0, 1, 1], [], []>} : vector<8x8xbf16>, vector<8x4xbf16>, vector<8x4xf32> -> vector<8x4xf32>
    %170 = arith.truncf %169 : vector<8x4xf32> to vector<8x4xbf16>
    %c0_81 = arith.constant 0 : index
    %c5 = arith.constant 5 : index
    %c0_82 = arith.constant 0 : index
    %c0_83 = arith.constant 0 : index
    %171 = vector.load %arg6[%c0_81, %c5, %c0_82, %c0_83] : memref<1x8x4x32xbf16, #tpu.memory_space<vmem>>, vector<1x1x4x32xbf16>
    %172 = vector.shape_cast %171 : vector<1x1x4x32xbf16> to vector<4x32xbf16>
    %cst_84 = arith.constant dense<0.000000e+00> : vector<8x32xf32>
    %173 = tpu.matmul %170, %172, %cst_84 {dimension_numbers = #tpu.dot_dimension_numbers<[1], [0], [0], [1], [0, 0, 1, 1], [], []>} : vector<8x4xbf16>, vector<4x32xbf16>, vector<8x32xf32> -> vector<8x32xf32>
    %174 = arith.addf %147, %173 : vector<8x32xf32>
    %175 = vector.extract_strided_slice %5 {offsets = [0, 24], sizes = [8, 4], strides = [1, 1]} : vector<8x32xbf16> to vector<8x4xbf16>
    %cst_85 = arith.constant dense<0.000000e+00> : vector<8x4xf32>
    %176 = tpu.matmul %175, %7, %cst_85 {dimension_numbers = #tpu.dot_dimension_numbers<[1], [0], [0], [1], [0, 0, 1, 1], [], []>} : vector<8x4xbf16>, vector<4x4xbf16>, vector<8x4xf32> -> vector<8x4xf32>
    %cst_86 = arith.constant dense<0.000000e+00> : vector<8x4xf32>
    %177 = tpu.matmul %175, %9, %cst_86 {dimension_numbers = #tpu.dot_dimension_numbers<[1], [0], [0], [1], [0, 0, 1, 1], [], []>} : vector<8x4xbf16>, vector<4x4xbf16>, vector<8x4xf32> -> vector<8x4xf32>
    %cst_87 = arith.constant dense<0.000000e+00> : vector<8x4xf32>
    %178 = tpu.matmul %175, %11, %cst_87 {dimension_numbers = #tpu.dot_dimension_numbers<[1], [0], [0], [1], [0, 0, 1, 1], [], []>} : vector<8x4xbf16>, vector<4x4xbf16>, vector<8x4xf32> -> vector<8x4xf32>
    %179 = arith.truncf %176 : vector<8x4xf32> to vector<8x4xbf16>
    %180 = arith.truncf %177 : vector<8x4xf32> to vector<8x4xbf16>
    %cst_88 = arith.constant dense<0.000000e+00> : vector<8x8xf32>
    %181 = tpu.matmul %179, %180, %cst_88 {dimension_numbers = #tpu.dot_dimension_numbers<[1], [1], [0], [0], [0, 0, 1, 0], [], []>} : vector<8x4xbf16>, vector<8x4xbf16>, vector<8x8xf32> -> vector<8x8xf32>
    %cst_89 = arith.constant 5.000000e-01 : f32
    %182 = vector.broadcast %cst_89 : f32 to vector<8x8xf32>
    %183 = arith.mulf %181, %182 : vector<8x8xf32>
    %cst_90 = arith.constant dense<0xFF800000> : vector<8xf32>
    %184 = vector.multi_reduction <maximumf>, %183, %cst_90 [1] : vector<8x8xf32> to vector<8xf32>
    %185 = vector.shape_cast %184 : vector<8xf32> to vector<8x1xf32>
    %186 = vector.broadcast %185 : vector<8x1xf32> to vector<8x8xf32>
    %187 = arith.subf %183, %186 : vector<8x8xf32>
    %188 = math.exp %187 : vector<8x8xf32>
    %cst_91 = arith.constant dense<0.000000e+00> : vector<8xf32>
    %189 = vector.multi_reduction <add>, %188, %cst_91 [1] : vector<8x8xf32> to vector<8xf32>
    %190 = vector.shape_cast %189 : vector<8xf32> to vector<8x1xf32>
    %191 = tpu.reciprocal %190 {approx = true} : vector<8x1xf32> -> vector<8x1xf32>
    %192 = vector.broadcast %191 : vector<8x1xf32> to vector<8x8xf32>
    %193 = arith.mulf %188, %192 : vector<8x8xf32>
    %194 = arith.truncf %193 : vector<8x8xf32> to vector<8x8xbf16>
    %195 = arith.truncf %178 : vector<8x4xf32> to vector<8x4xbf16>
    %cst_92 = arith.constant dense<0.000000e+00> : vector<8x4xf32>
    %196 = tpu.matmul %194, %195, %cst_92 {dimension_numbers = #tpu.dot_dimension_numbers<[1], [0], [0], [1], [0, 0, 1, 1], [], []>} : vector<8x8xbf16>, vector<8x4xbf16>, vector<8x4xf32> -> vector<8x4xf32>
    %197 = arith.truncf %196 : vector<8x4xf32> to vector<8x4xbf16>
    %c0_93 = arith.constant 0 : index
    %c6 = arith.constant 6 : index
    %c0_94 = arith.constant 0 : index
    %c0_95 = arith.constant 0 : index
    %198 = vector.load %arg6[%c0_93, %c6, %c0_94, %c0_95] : memref<1x8x4x32xbf16, #tpu.memory_space<vmem>>, vector<1x1x4x32xbf16>
    %199 = vector.shape_cast %198 : vector<1x1x4x32xbf16> to vector<4x32xbf16>
    %cst_96 = arith.constant dense<0.000000e+00> : vector<8x32xf32>
    %200 = tpu.matmul %197, %199, %cst_96 {dimension_numbers = #tpu.dot_dimension_numbers<[1], [0], [0], [1], [0, 0, 1, 1], [], []>} : vector<8x4xbf16>, vector<4x32xbf16>, vector<8x32xf32> -> vector<8x32xf32>
    %201 = arith.addf %174, %200 : vector<8x32xf32>
    %202 = vector.extract_strided_slice %5 {offsets = [0, 28], sizes = [8, 4], strides = [1, 1]} : vector<8x32xbf16> to vector<8x4xbf16>
    %cst_97 = arith.constant dense<0.000000e+00> : vector<8x4xf32>
    %203 = tpu.matmul %202, %7, %cst_97 {dimension_numbers = #tpu.dot_dimension_numbers<[1], [0], [0], [1], [0, 0, 1, 1], [], []>} : vector<8x4xbf16>, vector<4x4xbf16>, vector<8x4xf32> -> vector<8x4xf32>
    %cst_98 = arith.constant dense<0.000000e+00> : vector<8x4xf32>
    %204 = tpu.matmul %202, %9, %cst_98 {dimension_numbers = #tpu.dot_dimension_numbers<[1], [0], [0], [1], [0, 0, 1, 1], [], []>} : vector<8x4xbf16>, vector<4x4xbf16>, vector<8x4xf32> -> vector<8x4xf32>
    %cst_99 = arith.constant dense<0.000000e+00> : vector<8x4xf32>
    %205 = tpu.matmul %202, %11, %cst_99 {dimension_numbers = #tpu.dot_dimension_numbers<[1], [0], [0], [1], [0, 0, 1, 1], [], []>} : vector<8x4xbf16>, vector<4x4xbf16>, vector<8x4xf32> -> vector<8x4xf32>
    %206 = arith.truncf %203 : vector<8x4xf32> to vector<8x4xbf16>
    %207 = arith.truncf %204 : vector<8x4xf32> to vector<8x4xbf16>
    %cst_100 = arith.constant dense<0.000000e+00> : vector<8x8xf32>
    %208 = tpu.matmul %206, %207, %cst_100 {dimension_numbers = #tpu.dot_dimension_numbers<[1], [1], [0], [0], [0, 0, 1, 0], [], []>} : vector<8x4xbf16>, vector<8x4xbf16>, vector<8x8xf32> -> vector<8x8xf32>
    %cst_101 = arith.constant 5.000000e-01 : f32
    %209 = vector.broadcast %cst_101 : f32 to vector<8x8xf32>
    %210 = arith.mulf %208, %209 : vector<8x8xf32>
    %cst_102 = arith.constant dense<0xFF800000> : vector<8xf32>
    %211 = vector.multi_reduction <maximumf>, %210, %cst_102 [1] : vector<8x8xf32> to vector<8xf32>
    %212 = vector.shape_cast %211 : vector<8xf32> to vector<8x1xf32>
    %213 = vector.broadcast %212 : vector<8x1xf32> to vector<8x8xf32>
    %214 = arith.subf %210, %213 : vector<8x8xf32>
    %215 = math.exp %214 : vector<8x8xf32>
    %cst_103 = arith.constant dense<0.000000e+00> : vector<8xf32>
    %216 = vector.multi_reduction <add>, %215, %cst_103 [1] : vector<8x8xf32> to vector<8xf32>
    %217 = vector.shape_cast %216 : vector<8xf32> to vector<8x1xf32>
    %218 = tpu.reciprocal %217 {approx = true} : vector<8x1xf32> -> vector<8x1xf32>
    %219 = vector.broadcast %218 : vector<8x1xf32> to vector<8x8xf32>
    %220 = arith.mulf %215, %219 : vector<8x8xf32>
    %221 = arith.truncf %220 : vector<8x8xf32> to vector<8x8xbf16>
    %222 = arith.truncf %205 : vector<8x4xf32> to vector<8x4xbf16>
    %cst_104 = arith.constant dense<0.000000e+00> : vector<8x4xf32>
    %223 = tpu.matmul %221, %222, %cst_104 {dimension_numbers = #tpu.dot_dimension_numbers<[1], [0], [0], [1], [0, 0, 1, 1], [], []>} : vector<8x8xbf16>, vector<8x4xbf16>, vector<8x4xf32> -> vector<8x4xf32>
    %224 = arith.truncf %223 : vector<8x4xf32> to vector<8x4xbf16>
    %c0_105 = arith.constant 0 : index
    %c7 = arith.constant 7 : index
    %c0_106 = arith.constant 0 : index
    %c0_107 = arith.constant 0 : index
    %225 = vector.load %arg6[%c0_105, %c7, %c0_106, %c0_107] : memref<1x8x4x32xbf16, #tpu.memory_space<vmem>>, vector<1x1x4x32xbf16>
    %226 = vector.shape_cast %225 : vector<1x1x4x32xbf16> to vector<4x32xbf16>
    %cst_108 = arith.constant dense<0.000000e+00> : vector<8x32xf32>
    %227 = tpu.matmul %224, %226, %cst_108 {dimension_numbers = #tpu.dot_dimension_numbers<[1], [0], [0], [1], [0, 0, 1, 1], [], []>} : vector<8x4xbf16>, vector<4x32xbf16>, vector<8x32xf32> -> vector<8x32xf32>
    %228 = arith.addf %201, %227 : vector<8x32xf32>
    %c0_109 = arith.constant 0 : index
    %c0_110 = arith.constant 0 : index
    %c0_111 = arith.constant 0 : index
    %229 = vector.load %arg7[%c0_109, %c0_110, %c0_111] : memref<1x1x32xf32, #tpu.memory_space<vmem>>, vector<1x1x32xf32>
    %230 = vector.shape_cast %229 : vector<1x1x32xf32> to vector<1x32xf32>
    %231 = vector.broadcast %230 : vector<1x32xf32> to vector<8x32xf32>
    %232 = arith.addf %228, %231 : vector<8x32xf32>
    %233 = arith.addf %232, %4 : vector<8x32xf32>
    %c0_112 = arith.constant 0 : index
    %c0_113 = arith.constant 0 : index
    %c0_114 = arith.constant 0 : index
    %234 = vector.load %arg8[%c0_112, %c0_113, %c0_114] : memref<1x1x32xf32, #tpu.memory_space<vmem>>, vector<1x1x32xf32>
    %235 = vector.shape_cast %234 : vector<1x1x32xf32> to vector<1x32xf32>
    %c0_115 = arith.constant 0 : index
    %c0_116 = arith.constant 0 : index
    %c0_117 = arith.constant 0 : index
    %236 = vector.load %arg9[%c0_115, %c0_116, %c0_117] : memref<1x1x32xf32, #tpu.memory_space<vmem>>, vector<1x1x32xf32>
    %237 = vector.shape_cast %236 : vector<1x1x32xf32> to vector<1x32xf32>
    %cst_118 = arith.constant dense<0.000000e+00> : vector<8xf32>
    %238 = vector.multi_reduction <add>, %233, %cst_118 [1] : vector<8x32xf32> to vector<8xf32>
    %239 = vector.shape_cast %238 : vector<8xf32> to vector<8x1xf32>
    %cst_119 = arith.constant 3.200000e+01 : f32
    %240 = vector.broadcast %cst_119 : f32 to vector<8x1xf32>
    %241 = arith.divf %239, %240 : vector<8x1xf32>
    %242 = vector.broadcast %241 : vector<8x1xf32> to vector<8x32xf32>
    %243 = arith.subf %233, %242 : vector<8x32xf32>
    %244 = arith.mulf %243, %243 : vector<8x32xf32>
    %cst_120 = arith.constant dense<0.000000e+00> : vector<8xf32>
    %245 = vector.multi_reduction <add>, %244, %cst_120 [1] : vector<8x32xf32> to vector<8xf32>
    %246 = vector.shape_cast %245 : vector<8xf32> to vector<8x1xf32>
    %cst_121 = arith.constant 3.200000e+01 : f32
    %247 = vector.broadcast %cst_121 : f32 to vector<8x1xf32>
    %248 = arith.divf %246, %247 : vector<8x1xf32>
    %249 = vector.broadcast %241 : vector<8x1xf32> to vector<8x32xf32>
    %250 = arith.subf %233, %249 : vector<8x32xf32>
    %cst_122 = arith.constant 9.99999974E-6 : f32
    %251 = vector.broadcast %cst_122 : f32 to vector<8x1xf32>
    %252 = arith.addf %248, %251 : vector<8x1xf32>
    %253 = math.rsqrt %252 : vector<8x1xf32>
    %254 = vector.broadcast %253 : vector<8x1xf32> to vector<8x32xf32>
    %255 = arith.mulf %250, %254 : vector<8x32xf32>
    %256 = vector.broadcast %235 : vector<1x32xf32> to vector<8x32xf32>
    %257 = arith.mulf %255, %256 : vector<8x32xf32>
    %258 = vector.broadcast %237 : vector<1x32xf32> to vector<8x32xf32>
    %259 = arith.addf %257, %258 : vector<8x32xf32>
    %260 = arith.truncf %259 : vector<8x32xf32> to vector<8x32xbf16>
    %c0_123 = arith.constant 0 : index
    %c0_124 = arith.constant 0 : index
    %c0_125 = arith.constant 0 : index
    %261 = vector.load %arg10[%c0_123, %c0_124, %c0_125] : memref<1x32x128xbf16, #tpu.memory_space<vmem>>, vector<1x32x128xbf16>
    %262 = vector.shape_cast %261 : vector<1x32x128xbf16> to vector<32x128xbf16>
    %cst_126 = arith.constant dense<0.000000e+00> : vector<8x128xf32>
    %263 = tpu.matmul %260, %262, %cst_126 {dimension_numbers = #tpu.dot_dimension_numbers<[1], [0], [0], [1], [0, 0, 1, 1], [], []>} : vector<8x32xbf16>, vector<32x128xbf16>, vector<8x128xf32> -> vector<8x128xf32>
    %c0_127 = arith.constant 0 : index
    %c0_128 = arith.constant 0 : index
    %c0_129 = arith.constant 0 : index
    %264 = vector.load %arg11[%c0_127, %c0_128, %c0_129] : memref<1x1x128xf32, #tpu.memory_space<vmem>>, vector<1x1x128xf32>
    %265 = vector.shape_cast %264 : vector<1x1x128xf32> to vector<1x128xf32>
    %266 = vector.broadcast %265 : vector<1x128xf32> to vector<8x128xf32>
    %267 = arith.addf %263, %266 : vector<8x128xf32>
    %cst_130 = arith.constant 0.000000e+00 : f32
    %268 = vector.broadcast %cst_130 : f32 to vector<8x128xf32>
    %269 = arith.maximumf %267, %268 : vector<8x128xf32>
    %270 = arith.truncf %269 : vector<8x128xf32> to vector<8x128xbf16>
    %c0_131 = arith.constant 0 : index
    %c0_132 = arith.constant 0 : index
    %c0_133 = arith.constant 0 : index
    %271 = vector.load %arg12[%c0_131, %c0_132, %c0_133] : memref<1x128x32xbf16, #tpu.memory_space<vmem>>, vector<1x128x32xbf16>
    %272 = vector.shape_cast %271 : vector<1x128x32xbf16> to vector<128x32xbf16>
    %cst_134 = arith.constant dense<0.000000e+00> : vector<8x32xf32>
    %273 = tpu.matmul %270, %272, %cst_134 {dimension_numbers = #tpu.dot_dimension_numbers<[1], [0], [0], [1], [0, 0, 1, 1], [], []>} : vector<8x128xbf16>, vector<128x32xbf16>, vector<8x32xf32> -> vector<8x32xf32>
    %c0_135 = arith.constant 0 : index
    %c0_136 = arith.constant 0 : index
    %c0_137 = arith.constant 0 : index
    %274 = vector.load %arg13[%c0_135, %c0_136, %c0_137] : memref<1x1x32xf32, #tpu.memory_space<vmem>>, vector<1x1x32xf32>
    %275 = vector.shape_cast %274 : vector<1x1x32xf32> to vector<1x32xf32>
    %276 = vector.broadcast %275 : vector<1x32xf32> to vector<8x32xf32>
    %277 = arith.addf %273, %276 : vector<8x32xf32>
    %278 = arith.addf %277, %259 : vector<8x32xf32>
    %c0_138 = arith.constant 0 : index
    %c0_139 = arith.constant 0 : index
    %c0_140 = arith.constant 0 : index
    %279 = vector.load %arg14[%c0_138, %c0_139, %c0_140] : memref<1x1x32xf32, #tpu.memory_space<vmem>>, vector<1x1x32xf32>
    %280 = vector.shape_cast %279 : vector<1x1x32xf32> to vector<1x32xf32>
    %c0_141 = arith.constant 0 : index
    %c0_142 = arith.constant 0 : index
    %c0_143 = arith.constant 0 : index
    %281 = vector.load %arg15[%c0_141, %c0_142, %c0_143] : memref<1x1x32xf32, #tpu.memory_space<vmem>>, vector<1x1x32xf32>
    %282 = vector.shape_cast %281 : vector<1x1x32xf32> to vector<1x32xf32>
    %cst_144 = arith.constant dense<0.000000e+00> : vector<8xf32>
    %283 = vector.multi_reduction <add>, %278, %cst_144 [1] : vector<8x32xf32> to vector<8xf32>
    %284 = vector.shape_cast %283 : vector<8xf32> to vector<8x1xf32>
    %cst_145 = arith.constant 3.200000e+01 : f32
    %285 = vector.broadcast %cst_145 : f32 to vector<8x1xf32>
    %286 = arith.divf %284, %285 : vector<8x1xf32>
    %287 = vector.broadcast %286 : vector<8x1xf32> to vector<8x32xf32>
    %288 = arith.subf %278, %287 : vector<8x32xf32>
    %289 = arith.mulf %288, %288 : vector<8x32xf32>
    %cst_146 = arith.constant dense<0.000000e+00> : vector<8xf32>
    %290 = vector.multi_reduction <add>, %289, %cst_146 [1] : vector<8x32xf32> to vector<8xf32>
    %291 = vector.shape_cast %290 : vector<8xf32> to vector<8x1xf32>
    %cst_147 = arith.constant 3.200000e+01 : f32
    %292 = vector.broadcast %cst_147 : f32 to vector<8x1xf32>
    %293 = arith.divf %291, %292 : vector<8x1xf32>
    %294 = vector.broadcast %286 : vector<8x1xf32> to vector<8x32xf32>
    %295 = arith.subf %278, %294 : vector<8x32xf32>
    %cst_148 = arith.constant 9.99999974E-6 : f32
    %296 = vector.broadcast %cst_148 : f32 to vector<8x1xf32>
    %297 = arith.addf %293, %296 : vector<8x1xf32>
    %298 = math.rsqrt %297 : vector<8x1xf32>
    %299 = vector.broadcast %298 : vector<8x1xf32> to vector<8x32xf32>
    %300 = arith.mulf %295, %299 : vector<8x32xf32>
    %301 = vector.broadcast %280 : vector<1x32xf32> to vector<8x32xf32>
    %302 = arith.mulf %300, %301 : vector<8x32xf32>
    %303 = vector.broadcast %282 : vector<1x32xf32> to vector<8x32xf32>
    %304 = arith.addf %302, %303 : vector<8x32xf32>
    %c0_149 = arith.constant 0 : index
    %c0_150 = arith.constant 0 : index
    %c0_151 = arith.constant 0 : index
    %305 = vector.load %arg16[%c0_149, %c0_150, %c0_151] : memref<1x8x32xf32, #tpu.memory_space<vmem>>, vector<1x8x32xf32>
    %306 = vector.shape_cast %305 : vector<1x8x32xf32> to vector<8x32xf32>
    %307 = vector.shape_cast %304 : vector<8x32xf32> to vector<1x8x32xf32>
    tpu.vector_store %arg16[%c0_149, %c0_150, %c0_151], %307 {strides = array<i32>} : memref<1x8x32xf32, #tpu.memory_space<vmem>>, vector<1x8x32xf32>,
    return
  }
  func.func @transform_0(%arg0: i32, %arg1: i32) -> (i32, i32, i32) {
    %c0_i32 = arith.constant 0 : i32
    %c0_i32_0 = arith.constant 0 : i32
    %c0_i32_1 = arith.constant 0 : i32
    return %arg0, %c0_i32, %c0_i32_0 : i32, i32, i32
  }
  func.func @transform_1(%arg0: i32, %arg1: i32) -> (i32, i32, i32) {
    %c0_i32 = arith.constant 0 : i32
    %c0_i32_0 = arith.constant 0 : i32
    %c0_i32_1 = arith.constant 0 : i32
    return %arg1, %c0_i32, %c0_i32_0 : i32, i32, i32
  }
  func.func @transform_2(%arg0: i32, %arg1: i32) -> (i32, i32, i32) {
    %c0_i32 = arith.constant 0 : i32
    %c0_i32_0 = arith.constant 0 : i32
    %c0_i32_1 = arith.constant 0 : i32
    return %arg1, %c0_i32, %c0_i32_0 : i32, i32, i32
  }
  func.func @transform_3(%arg0: i32, %arg1: i32) -> (i32, i32, i32) {
    %c0_i32 = arith.constant 0 : i32
    %c0_i32_0 = arith.constant 0 : i32
    %c0_i32_1 = arith.constant 0 : i32
    return %arg1, %c0_i32, %c0_i32_0 : i32, i32, i32
  }
  func.func @transform_4(%arg0: i32, %arg1: i32) -> (i32, i32, i32, i32) {
    %c0_i32 = arith.constant 0 : i32
    %c0_i32_0 = arith.constant 0 : i32
    %c0_i32_1 = arith.constant 0 : i32
    %c0_i32_2 = arith.constant 0 : i32
    return %arg1, %c0_i32, %c0_i32_0, %c0_i32_1 : i32, i32, i32, i32
  }
  func.func @transform_5(%arg0: i32, %arg1: i32) -> (i32, i32, i32) {
    %c0_i32 = arith.constant 0 : i32
    %c0_i32_0 = arith.constant 0 : i32
    %c0_i32_1 = arith.constant 0 : i32
    return %arg1, %c0_i32, %c0_i32_0 : i32, i32, i32
  }
  func.func @transform_6(%arg0: i32, %arg1: i32) -> (i32, i32, i32) {
    %c0_i32 = arith.constant 0 : i32
    %c0_i32_0 = arith.constant 0 : i32
    %c0_i32_1 = arith.constant 0 : i32
    return %arg1, %c0_i32, %c0_i32_0 : i32, i32, i32
  }
  func.func @transform_7(%arg0: i32, %arg1: i32) -> (i32, i32, i32) {
    %c0_i32 = arith.constant 0 : i32
    %c0_i32_0 = arith.constant 0 : i32
    %c0_i32_1 = arith.constant 0 : i32
    return %arg1, %c0_i32, %c0_i32_0 : i32, i32, i32
  }
  func.func @transform_8(%arg0: i32, %arg1: i32) -> (i32, i32, i32) {
    %c0_i32 = arith.constant 0 : i32
    %c0_i32_0 = arith.constant 0 : i32
    %c0_i32_1 = arith.constant 0 : i32
    return %arg1, %c0_i32, %c0_i32_0 : i32, i32, i32
  }
  func.func @transform_9(%arg0: i32, %arg1: i32) -> (i32, i32, i32) {
    %c0_i32 = arith.constant 0 : i32
    %c0_i32_0 = arith.constant 0 : i32
    %c0_i32_1 = arith.constant 0 : i32
    return %arg1, %c0_i32, %c0_i32_0 : i32, i32, i32
  }
  func.func @transform_10(%arg0: i32, %arg1: i32) -> (i32, i32, i32) {
    %c0_i32 = arith.constant 0 : i32
    %c0_i32_0 = arith.constant 0 : i32
    %c0_i32_1 = arith.constant 0 : i32
    return %arg1, %c0_i32, %c0_i32_0 : i32, i32, i32
  }
  func.func @transform_11(%arg0: i32, %arg1: i32) -> (i32, i32, i32) {
    %c0_i32 = arith.constant 0 : i32
    %c0_i32_0 = arith.constant 0 : i32
    %c0_i32_1 = arith.constant 0 : i32
    return %arg1, %c0_i32, %c0_i32_0 : i32, i32, i32
  }
  func.func @transform_12(%arg0: i32, %arg1: i32) -> (i32, i32, i32) {
    %c0_i32 = arith.constant 0 : i32
    %c0_i32_0 = arith.constant 0 : i32
    %c0_i32_1 = arith.constant 0 : i32
    return %arg1, %c0_i32, %c0_i32_0 : i32, i32, i32
  }
  func.func @transform_13(%arg0: i32, %arg1: i32) -> (i32, i32, i32) {
    %c0_i32 = arith.constant 0 : i32
    %c0_i32_0 = arith.constant 0 : i32
    %c0_i32_1 = arith.constant 0 : i32
    return %arg1, %c0_i32, %c0_i32_0 : i32, i32, i32
  }
  func.func @transform_14(%arg0: i32, %arg1: i32) -> (i32, i32, i32) {
    %c0_i32 = arith.constant 0 : i32
    %c0_i32_0 = arith.constant 0 : i32
    %c0_i32_1 = arith.constant 0 : i32
    return %arg0, %c0_i32, %c0_i32_0 : i32, i32, i32
  }
}

</mosaic_0001>

<bundles_post_ra>
// kernel: tpu_custom_call.1
= control target key start
LH: loop header
LB: loop body
LE: loop exit
PB: predicated region body
PF: predicated region fallthrough
CT: control target
= control target key end

     0   :  { %s2930_s0 = inlined_call_operand.vmem [shape: f32[2,8,32], index: 0, kind: input, shape index: {}]   ;;  %s2931_s1 = inlined_call_operand.vmem [shape: bf16[2,4,4], index: 1, kind: input, shape index: {}]   ;;  %s2932_s2 = inlined_call_operand.vmem [shape: bf16[2,4,4], index: 2, kind: input, shape index: {}]   ;;  %s2933_s3 = inlined_call_operand.vmem [shape: bf16[2,4,4], index: 3, kind: input, shape index: {}]   ;;  %s2934_s4 = inlined_call_operand.vmem [shape: bf16[2,8,4,32], index: 4, kind: input, shape index: {}]   ;;  %s2935_s5 = inlined_call_operand.vmem [shape: f32[2,1,32], index: 5, kind: input, shape index: {}]   ;;  %s2936_s6 = inlined_call_operand.vmem [shape: f32[2,1,32], index: 6, kind: input, shape index: {}]   ;;  %s2937_s7 = inlined_call_operand.vmem [shape: f32[2,1,32], index: 7, kind: input, shape index: {}]   ;;  %s2938_s8 = inlined_call_operand.vmem [shape: bf16[2,32,128], index: 8, kind: input, shape index: {}]   ;;  %s2939_s9 = inlined_call_operand.vmem [shape: f32[2,1,128], index: 9, kind: input, shape index: {}]   ;;  %s2940_s10 = inlined_call_operand.vmem [shape: bf16[2,128,32], index: 10, kind: input, shape index: {}]   ;;  %s2941_s11 = inlined_call_operand.vmem [shape: f32[2,1,32], index: 11, kind: input, shape index: {}]   ;;  %s2942_s12 = inlined_call_operand.vmem [shape: f32[2,1,32], index: 12, kind: input, shape index: {}]   ;;  %s2943_s13 = inlined_call_operand.vmem [shape: f32[2,1,32], index: 13, kind: input, shape index: {}]   ;;  %s2944_s14 = inlined_call_operand.hbm [shape: f32[2,8,32], index: 14, kind: output, shape index: {}]  }
   0x1   :  { %2961 = sst [smem:[#allocation19_spill]] %s2930_s0 }
   0x2   :  { %2962 = sst [smem:[#allocation20_spill]] %s2931_s1 }
   0x3   :  { %2963 = sst [smem:[#allocation21_spill]] %s2932_s2 }
   0x4   :  { %2964 = sst [smem:[#allocation22_spill]] %s2934_s4 }
   0x5   :  { %2965 = sst [smem:[#allocation23_spill]] %s2937_s7 }
   0x6   :  { %2966 = sst [smem:[#allocation24_spill]] %s2938_s8 }
   0x7   :  { %2967 = sst [smem:[#allocation25_spill]] %s2942_s12 }
   0x8   :  { %2968 = sst [smem:[#allocation26_spill]] %s2943_s13 }
   0x9   :  { %2969 = sst [smem:[#allocation27_spill]] %s2944_s14 }
   0xa   :  { %19 = vsyncpa [#allocation3], 0 }
   0xb   :  { %21 = vsyncpa [#allocation3 + $0x1], 0  ;;  %s2530_s29 = smov 0   ;;  %s2532_s30 = smov 0  }
   0xc   :  { %s2534_s15 = smov 0   ;;  %s2536_s16 = smov 0  }
   0xd   :  { %s2538_s17 = smov 0   ;;  %s2540_s18 = smov 0  }
   0xe   :  { %s2542_s19 = smov 0   ;;  %s2544_s20 = smov 0  }
   0xf LB: > { %2970 = sst [smem:[#allocation5_spill]] %s2417_s29  ;;  %s2097_s21 = sadd.s32 4294967295, %s2445_s20   ;;  %s2445_s20 = sphi %s2544_s20, %s27_s20   ;;  %s2441_s19 = sphi %s2542_s19, %s3018_s19   ;;  %s2437_s18 = sphi %s2540_s18, %s3017_s18   ;;  %s2433_s17 = sphi %s2538_s17, %s3016_s17   ;;  %s2429_s16 = sphi %s2536_s16, %s3015_s16   ;;  %s2425_s15 = sphi %s2534_s15, %s3014_s15   ;;  %s2421_s30 = sphi %s2532_s30, %s3013_s30   ;;  %s2417_s29 = sphi %s2530_s29, %s3012_s29  }
  0x10   : > { %2971 = sst [smem:[#allocation6_spill]] %s2421_s30  ;;  %s2098_s22 = sadd.s32 4294967294, %s2445_s20  }
  0x11   : > { %2972 = sst [smem:[#allocation7_spill]] %s2425_s15  ;;  %s36_s23 = sadd.s32 1, %s2437_s18 }
  0x12   : > { %2973 = sst [smem:[#allocation8_spill]] %s2429_s16  ;;  %p37_p0 = scmp.ge.s32.totalorder %s36_s23, 2 }
  0x13   : > { %2974 = sst [smem:[#allocation9_spill]] %s2433_s17  ;;  %s39_s24 = sadd.s32 1, %s2441_s19 }
  0x14   : > { %2975 = sst [smem:[#allocation10_spill]] %s2437_s18  ;;  %p420_p1 = scmp.ne.s32.totalorder %s2425_s15, %s2421_s30 }
  0x15   : > { %2976 = sst [smem:[#allocation11_spill]] %s2441_s19  ;;  %p421_p2 = scmp.eq.s32.totalorder %s2097_s21, 3 }
  0x16   : > { %2977 = sst [smem:[#allocation12_spill]] %s2445_s20  ;;  %s3020_s23 = smov (%p37_p0, %s36_s23), 0 }
  0x17   : > { %2978 = sst [smem:[#allocation13_spill]] %s3020_s23  ;;  %s3022_s24 = smov (!%p37_p0, %s39_s24), %s2441_s19 }
  0x18   : > { %p2579_p3 = por %p421_p2, %p420_p1  ;;  %p426_p4 = scmp.ne.s32.totalorder %s2421_s30, %s2417_s29 }
  0x19   : > { %p41_p5 = scmp.ge.s32.totalorder %s3022_s24, 2  ;;  %p427_p6 = scmp.eq.s32.totalorder %s2098_s22, 3 }
  0x1a   : > { %s2979_s25 = scalar_select %p2579_p3, 1, 0 }
  0x1b   : > { %p2101_p7 = scmp.ge.s32.totalorder %s2445_s20, 1  ;;  %p539_p8 = scmp.lt.s32.totalorder %s2445_s20, 5 }
  0x1c   : > { %2980 = sst [smem:[#allocation14_spill]] %s2979_s25  ;;  %s3024_s24 = smov (%p41_p5, %s3022_s24), 0 }
  0x1d   : > { %2981 = sst [smem:[#allocation15_spill]] %s3024_s24  ;;  %p2589_p9 = por %p427_p6, %p426_p4 }
  0x1e   : > { %p540_p10 = pnand %p2101_p7, %p539_p8  ;;  %s407_s27 = ssub.s32 %s2441_s19, %s3024_s24 }
  0x1f   : > { %s2982_s26 = scalar_select %p2589_p9, 1, 0 }
  0x20   : > { %s410_s28 = sadd.s32 1, %s2425_s15  ;;  %p408_p11 = scmp.eq.s32.totalorder %s407_s27, 0 }
  0x21   : > { %2983 = sst [smem:[#allocation16_spill]] %s2982_s26  ;;  %543 = sbr.rel (%p540_p10) target bundleno = 5297 (0x14b1), region = 76 }
  0x22   : > { %s2597_s21 = scalar_select %p408_p11, %s2425_s15, %s410_s28  }
  0x24   : > { %2984 = sst [smem:[#allocation17_spill]] %s2597_s21 }
  0x26   : > { %s2949_s22 = sand.u32 1, %s2421_s30   ;;  %p632_p12 = scmp.lt.s32.totalorder %s2433_s17, 1 }
  0x27   : > { %s2102_s23 = sshll.u32 %s2949_s22, 3  ;;  %p636_p13 = scmp.lt.s32.totalorder %s2429_s16, 1 }
  0x28   : > { %s633_s18 = scalar_select %p632_p12, %s2433_s17, 1 }
  0x29   : > { %s2606_s26 = scalar_select %p636_p13, %s2429_s16, 1 }
  0x2a   : > { %s2103_s27 = sshll.u32 %s633_s18, 3  ;;  %s2985_s0 = sld [smem:[#allocation19_spill]] }
  0x2b   : > { %s2612_s22 = sshll.u32 %s2606_s26, 1  ;;  %s2986_s1 = sld [smem:[#allocation20_spill]] }
  0x2c   : > { %s2987_s2 = sld [smem:[#allocation21_spill]]  ;;  %s2214_s28 = sshll.u32 %s2606_s26, 4 }
  0x2d   : > { %s2988_s4 = sld [smem:[#allocation22_spill]]  ;;  %s677_s15 = scalar_lea.vmem %s2941_s11, %s2606_s26 }
  0x2e   : > { %s2991_s8 = sld [smem:[#allocation24_spill]] }
  0x30   : > { %s635_s19 = scalar_lea.vmem %s2985_s0, %s2103_s27  ;;  %s2671_s0 = scalar_lea.vmem [#allocation2], %s2102_s23 }
  0x31   : > { %s639_s29 = scalar_lea.vmem %s2986_s1, %s2612_s22  ;;  %s2994_s27 = sld [smem:[#allocation8_spill]] }
  0x32   : > { %s643_s14 = scalar_lea.vmem %s2987_s2, %s2612_s22  ;;  %s2992_s2 = sld [smem:[#allocation25_spill]] }
  0x33   : > { %s2630_s17 = scalar_lea.vmem %s2988_s4, %s2214_s28  ;;  %s669_s4 = scalar_lea.vmem %s2939_s9, %s2606_s26 }
  0x34   : > { %2989 = sst [smem:[#allocation18_spill]] %s2630_s17  ;;  %s2647_s24 = scalar_lea.vmem %s2991_s8, %s2214_s28 }
  0x35   : > { %s2216_s17 = sshll.u32 %s2606_s26, 6  ;;  %s2993_s8 = sld [smem:[#allocation26_spill]] }
  0x36   : > { %s2661_s12 = scalar_lea.vmem %s2940_s10, %s2216_s17 }
  0x37   : > { %p2113_p0 = scmp.ne.s32.totalorder %s2994_s27, 0 }
  0x38   : > { %s680_s30 = scalar_lea.vmem %s2992_s2, %s2606_s26 }
  0x39   : > { %688 = sbr.rel (%p2113_p0) target bundleno = 64 (0x40), region = 80 }
  0x3b   : > { %s683_s7 = scalar_lea.vmem %s2993_s8, %s2606_s26 }
  0x3e   : > { %v689_v0 = vld [vmem:[%s635_s19] sm:$0xff]  ;;  %vm690_vm0 = vcmask 261120  }
  0x3f   : > { %691 = vst.msk [vmem:[%s2671_s0] sm:$0xff] %vm690_vm0, %v689_v0 }
  0x40 PF: > { %v695_v1 = vld [vmem:[%s643_s14] sm:$0x3]  ;;  %vm701_vm1 = vcmask 1041408   ;;  %vm697_vm2 = vcmask 31744   ;;  %s2447_s2 = smov 124   ;;  %vm772_vm3 = vcmask 64512   ;;  %s2997_s25 = scalar_lea.vmem %s2935_s5, %s2606_s26 }
  0x41   : > { %v2679_v3 = vsel %vm701_vm1, %v695_v1, 0  ;;  %v694_v5 = vld [vmem:[%s639_s29] sm:$0x3]  ;;  %s2995_s29 = scalar_lea.vmem %s2933_s3, %s2612_s22  ;;  %vm789_vm4 = vcmask 1043456   ;;  %s2996_s17 = sld [smem:[#allocation18_spill]]  ;;  %vm1684_vm5 = vcmask 261120  }
  0x42   : > { %728 = vmatpush.bf16.msra.mxu2 %v2679_v3  ;;  %v2685_v6 = vsel %vm701_vm1, %v694_v5, 0  ;;  %v696_v16 = vld [vmem:[%s2995_s29] sm:$0x3]  ;;  %s2448_s19 = smov 120   ;;  %s2449_s23 = smov 116  }
  0x43   : > { %712 = vmatpush.bf16.msra.mxu0 %v2685_v6  ;;  %823 = vmatpush.bf16.msra.mxu1 %v2685_v6  ;;  %v2702_v18 = vsel %vm701_vm1, %v696_v16, 0  ;;  %s2450_s22 = smov 112   ;;  %s2451_s13 = smov 108  }
  0x44   : > { %s2452_s16 = smov 104   ;;  %s2453_s1 = smov 100  }
  0x45   : > { %s2998_s18 = scalar_lea.vmem %s2936_s6, %s2606_s26  ;;  %s2999_s8 = sld [smem:[#allocation23_spill]] }
  0x46   : > { %v2676_v2 = vld [vmem:[%s2671_s0] sm:$0xff]  ;;  %744 = vmatpush.bf16.msrb.mxu2 %v2702_v18  ;;  %s3004_s20 = sld [smem:[#allocation27_spill]] }
  0x47   : > { %v693_v4 = vpack.c.bf16 %v2676_v2, %v2676_v2  ;;  %v807_v47 = vld [vmem:[%s2996_s17] sm:$0x3] }
  0x48   : > { %v935_v48 = vsel %vm701_vm1, %v807_v47, 0 }
  0x49   : > { %2115 = vmatmul.msk.bf16.vlgmr.msra.gmra.mxu2 %vm697_vm2, %v693_v4  ;;  %2114 = vmatmul.msk.bf16.vlgmr.msra.gmra.mxu0 %vm697_vm2, %v693_v4  ;;  %v809_v7 = vunpack.c.l.b16 %v693_v4 }
  0x4a   : > { %836 = vmatpush.bf16.msra.mxu2 %v2679_v3 }
  0x4b   : > { %v2691_v8 = vpack.c.b16 %v809_v7, %v809_v7  ;;  %v2124_v7 = vld [vmem:[%s2996_s17 + $0x2] sm:$0x3]  ;;  %s3000_s14 = scalar_lea.vmem %s2999_s8, %s2606_s26  ;;  %s1889_s8 = sshll.u32 %s2671_s0, 4  ;;  %s1890_s8 = int_to_ptr.vmem [resolvable:$true] %s1889_s8 }
  0x4d   : > { %811 = vrot.lane.b32.xlu0 %v2691_v8, %s2447_s2 }
  0x59   : > { %2116 = vmatmul.msk.bf16.vlgmr.msrb.gmra.mxu2 %vm697_vm2, %v693_v4 }
  0xbf   : > { %v812_v17 = vpop.permute.xlu0 %811 }
  0xc0   : > { %2119 = vmatmul.msk.bf16.vlgmr.msra.gmra.mxu1 %vm697_vm2, %v812_v17  ;;  %2120 = vmatmul.msk.bf16.vlgmr.msra.gmra.mxu2 %vm697_vm2, %v812_v17 }
  0xc6   : > { %v714_v9 = vpop.f32.mrf.mxu0 }
  0xc7   : > { %v750_v14 = vpack.c.bf16 %v714_v9, %v714_v9  ;;  %v916_v9 = vsel %vm701_vm1, %v2124_v7, 0 }
  0xc8   : > { %925 = vmatpush.bf16.msrb.mxu2 %v916_v9 }
  0xcc   : > { %v730_v10 = vpop.f32.mrf.mxu2  ;;  %988 = vmatpush.bf16.msra.mxu2 %v2702_v18 }
  0xcd   : > { %v751_v11 = vpack.c.bf16 %v730_v10, %v730_v10 }
  0xce   : > { %v716_v13 = vpop.f32.mrf.mxu0 }
  0xcf   : > { %v756_v12 = vsel %vm697_vm2, %v751_v11, 0 }
  0xd0   : > { %765 = vmatpush.bf16.xpose.msra.mxu3 %v756_v12 }
  0xd4   : > { %v732_v15 = vpop.f32.mrf.mxu2 }
  0xd7   : > { %2117 = vmatmul.msk.bf16.vlgmr.msra.gmra.mxu3 %vm697_vm2, %v750_v14 }
  0xd8   : > { %849 = vmatpush.bf16.msrb.mxu3 %v2702_v18 }
  0xdc   : > { %v746_v25 = vpop.f32.mrf.mxu2  ;;  %944 = vmatpush.bf16.msra.mxu3 %v935_v48 }
  0xdd   : > { %v785_v27 = vpack.c.bf16 %v746_v25, %v746_v25 }
  0xdf   : > { %v791_v29 = vsel %vm789_vm4, %v785_v27, 0 }
  0xe0   : > { %800 = vmatpush.bf16.msrb.mxu0 %v791_v29 }
  0xe4   : > { %v748_v33 = vpop.f32.mrf.mxu2 }
  0xe7   : > { %2121 = vmatmul.msk.bf16.vlgmr.msrb.gmra.mxu3 %vm697_vm2, %v812_v17 }
 0x13d   : > { %v825_v23 = vpop.f32.mrf.mxu1 }
 0x13e   : > { %v855_v46 = vpack.c.bf16 %v825_v23, %v825_v23 }
 0x143   : > { %v838_v36 = vpop.f32.mrf.mxu2 }
 0x144   : > { %v856_v37 = vpack.c.bf16 %v838_v36, %v838_v36 }
 0x145   : > { %v827_v24 = vpop.f32.mrf.mxu1 }
 0x146   : > { %v861_v40 = vsel %vm697_vm2, %v856_v37, 0 }
 0x147   : > { %870 = vmatpush.bf16.xpose.msra.mxu0 %v861_v40 }
 0x14b   : > { %v840_v41 = vpop.f32.mrf.mxu2 }
 0x14c   : > { %v2132_v41 = vld [vmem:[%s2996_s17 + $0x4] sm:$0x3] }
 0x15a   : > { %v767_v19 = vpop.f32.mrf.mxu3 }
 0x15b   : > { %v771_v20 = vmul.f32 0.5, %v767_v19 }
 0x15d   : > { %v773_v21 = vsel %vm772_vm3, %v771_v20, -inf }
 0x15e   : > { %774 = vmax.xlane.f32.xlu0 %v773_v21 }
 0x162   : > { %v769_v22 = vpop.f32.mrf.mxu3 }
 0x16a   : > { %v851_v26 = vpop.f32.mrf.mxu3 }
 0x16b   : > { %v889_v28 = vpack.c.bf16 %v851_v26, %v851_v26 }
 0x16d   : > { %v894_v30 = vsel %vm789_vm4, %v889_v28, 0 }
 0x16e   : > { %903 = vmatpush.bf16.msrb.mxu1 %v894_v30 }
 0x172   : > { %975 = vmatpush.bf16.msra.mxu1 %v2679_v3  ;;  %v853_v34 = vpop.f32.mrf.mxu3 }
 0x1d1   : > { %v775_v31 = vpop.xlane.xlu0 %774 }
 0x1d2   : > { %v776_v32 = vsub.f32 %v771_v20, %v775_v31 }
 0x1d4   : > { %v777_v35 = vmul.f32 1.442695, %v776_v32 }
 0x1d6   : > { %2313 = vpow2.f32 %v777_v35 }
 0x1dc   : > { %v2314_v38 = vpop.eup %2313 }
 0x1dd   : > { %v779_v39 = vsel %vm772_vm3, %v2314_v38, 0.0 }
 0x1de   : > { %780 = vadd.xlane.f32.xlu1 %v779_v39 }
 0x251   : > { %v781_v42 = vpop.xlane.xlu1 %780 }
 0x252   : > { %2315 = vrcp.f32 %v781_v42  ;;  %v1055_v42 = vsel %vm701_vm1, %v2132_v41, 0 }
 0x258   : > { %v2316_v43 = vpop.eup %2315 }
 0x259   : > { %v783_v44 = vmul.f32 %v2316_v43, %v2314_v38 }
 0x25b   : > { %v784_v45 = vpack.c.bf16 %v783_v44, %v783_v44 }
 0x25d   : > { %2118 = vmatmul.msk.bf16.vlgmr.msrb.gmra.mxu0 %vm772_vm3, %v784_v45 }
 0x25e   : > { %962 = vmatpush.bf16.msrb.mxu0 %v2685_v6 }
 0x26d   : > { %2122 = vmatmul.msk.bf16.vlgmr.msra.gmra.mxu0 %vm697_vm2, %v855_v46 }
 0x2da   : > { %v802_v49 = vpop.f32.mrf.mxu0 }
 0x2db   : > { %v806_v50 = vpack.c.bf16 %v802_v49, %v802_v49 }
 0x2dd   : > { %2126 = vmatmul.msk.bf16.vlgmr.msra.gmra.mxu3 %vm697_vm2, %v806_v50 }
 0x2e2   : > { %v804_v51 = vpop.f32.mrf.mxu0 }
 0x2ea   : > { %v872_v52 = vpop.f32.mrf.mxu0 }
 0x2eb   : > { %v876_v53 = vmul.f32 0.5, %v872_v52 }
 0x2ed   : > { %v877_v54 = vsel %vm772_vm3, %v876_v53, -inf }
 0x2ee   : > { %878 = vmax.xlane.f32.xlu1 %v877_v54 }
 0x2f2   : > { %v874_v55 = vpop.f32.mrf.mxu0 }
 0x360   : > { %v2724_v56 = vpop.f32.mrf.mxu3 }
 0x361   : > { %v879_v57 = vpop.xlane.xlu1 %878 }
 0x362   : > { %v880_v58 = vsub.f32 %v876_v53, %v879_v57 }
 0x364   : > { %v881_v59 = vmul.f32 1.442695, %v880_v58 }
 0x366   : > { %2317 = vpow2.f32 %v881_v59 }
 0x368   : > { %v948_v60 = vpop.f32.mrf.mxu3 }
 0x36c   : > { %v2318_v61 = vpop.eup %2317 }
 0x36d   : > { %v883_v62 = vsel %vm772_vm3, %v2318_v61, 0.0 }
 0x36e   : > { %884 = vadd.xlane.f32.xlu2 %v883_v62 }
 0x386   : > { %950 = vrot.lane.b32.xlu2 %v2691_v8, %s2448_s19 }
 0x3e1   : > { %v885_v63 = vpop.xlane.xlu2 %884 }
 0x3e2   : > { %2319 = vrcp.f32 %v885_v63 }
 0x3e8   : > { %v2320_v0 = vpop.eup %2319 }
 0x3e9   : > { %v887_v1 = vmul.f32 %v2320_v0, %v2318_v61  ;;  %v951_v4 = vpop.permute.xlu2 %950 }
 0x3ea   : > { %2127 = vmatmul.msk.bf16.vlgmr.msrb.gmra.mxu0 %vm697_vm2, %v951_v4 }
 0x3eb   : > { %v888_v5 = vpack.c.bf16 %v887_v1, %v887_v1 }
 0x3ed   : > { %2123 = vmatmul.msk.bf16.vlgmr.msrb.gmra.mxu1 %vm772_vm3, %v888_v5 }
 0x3ee   : > { %1064 = vmatpush.bf16.msrb.mxu1 %v1055_v42 }
 0x3fd   : > { %2128 = vmatmul.msk.bf16.vlgmr.msra.gmra.mxu1 %vm697_vm2, %v951_v4 }
 0x467   : > { %v964_v10 = vpop.f32.mrf.mxu0 }
 0x468   : > { %v994_v20 = vpack.c.bf16 %v964_v10, %v964_v10 }
 0x46a   : > { %v905_v11 = vpop.f32.mrf.mxu1 }
 0x46b   : > { %v909_v12 = vpack.c.bf16 %v905_v11, %v905_v11  ;;  %v2139_v11 = vld [vmem:[%s2996_s17 + $0x6] sm:$0x3] }
 0x46d   : > { %2125 = vmatmul.msk.bf16.vlgmr.msrb.gmra.mxu2 %vm697_vm2, %v909_v12  ;;  %v1176_v12 = vsel %vm701_vm1, %v2139_v11, 0 }
 0x46e   : > { %1083 = vmatpush.bf16.msrb.mxu2 %v2685_v6 }
 0x46f   : > { %v966_v13 = vpop.f32.mrf.mxu0 }
 0x472   : > { %v907_v14 = vpop.f32.mrf.mxu1 }
 0x47a   : > { %v977_v15 = vpop.f32.mrf.mxu1 }
 0x47b   : > { %v995_v16 = vpack.c.bf16 %v977_v15, %v977_v15 }
 0x47d   : > { %v1000_v17 = vsel %vm697_vm2, %v995_v16, 0  ;;  %2129 = vmatmul.msk.bf16.vlgmr.msra.gmra.mxu2 %vm697_vm2, %v951_v4 }
 0x47e   : > { %1009 = vmatpush.bf16.xpose.msrb.mxu3 %v1000_v17 }
 0x482   : > { %v979_v19 = vpop.f32.mrf.mxu1 }
 0x485   : > { %2130 = vmatmul.msk.bf16.vlgmr.msrb.gmra.mxu3 %vm697_vm2, %v994_v20 }
 0x486   : > { %1096 = vmatpush.bf16.msra.mxu3 %v2679_v3 }
 0x48a   : > { %1185 = vmatpush.bf16.msrb.mxu3 %v1176_v12 }
 0x4f0   : > { %v927_v21 = vpop.f32.mrf.mxu2 }
 0x4f1   : > { %v947_v58 = vadd.f32 %v2724_v56, %v927_v21 }
 0x4f8   : > { %v929_v22 = vpop.f32.mrf.mxu2 }
 0x500   : > { %v990_v23 = vpop.f32.mrf.mxu2 }
 0x501   : > { %v1028_v24 = vpack.c.bf16 %v990_v23, %v990_v23 }
 0x503   : > { %v1033_v25 = vsel %vm789_vm4, %v1028_v24, 0 }
 0x504   : > { %1042 = vmatpush.bf16.msra.mxu0 %v1033_v25 }
 0x508   : > { %1109 = vmatpush.bf16.msrb.mxu0 %v2702_v18  ;;  %v992_v26 = vpop.f32.mrf.mxu2  ;;  %v1011_v27 = vpop.f32.mrf.mxu3 }
 0x509   : > { %v1015_v28 = vmul.f32 0.5, %v1011_v27 }
 0x50b   : > { %v1016_v29 = vsel %vm772_vm3, %v1015_v28, -inf }
 0x50c   : > { %1017 = vmax.xlane.f32.xlu1 %v1016_v29 }
 0x510   : > { %v1013_v30 = vpop.f32.mrf.mxu3 }
 0x57f   : > { %v1018_v31 = vpop.xlane.xlu1 %1017 }
 0x580   : > { %v1019_v32 = vsub.f32 %v1015_v28, %v1018_v31 }
 0x582   : > { %v1020_v33 = vmul.f32 1.442695, %v1019_v32 }
 0x584   : > { %2321 = vpow2.f32 %v1020_v33 }
 0x58a   : > { %v2322_v34 = vpop.eup %2321 }
 0x58b   : > { %v1022_v35 = vsel %vm772_vm3, %v2322_v34, 0.0 }
 0x58c   : > { %1023 = vadd.xlane.f32.xlu1 %v1022_v35 }
 0x5a5   : > { %1071 = vrot.lane.b32.xlu1 %v2691_v8, %s2449_s23 }
 0x5ad   : > { %1192 = vrot.lane.b32.xlu1 %v2691_v8, %s2450_s22 }
 0x5ff   : > { %v1024_v36 = vpop.xlane.xlu1 %1023 }
 0x600   : > { %2323 = vrcp.f32 %v1024_v36 }
 0x606   : > { %v2324_v37 = vpop.eup %2323 }
 0x607   : > { %v1026_v38 = vmul.f32 %v2324_v37, %v2322_v34 }
 0x609   : > { %v1027_v39 = vpack.c.bf16 %v1026_v38, %v1026_v38 }
 0x60b   : > { %2131 = vmatmul.msk.bf16.vlgmr.msra.gmra.mxu0 %vm772_vm3, %v1027_v39 }
 0x60c   : > { %1204 = vmatpush.bf16.msra.mxu0 %v2685_v6 }
 0x617   : > { %v1072_v40 = vpop.permute.xlu1 %1071 }
 0x618   : > { %2134 = vmatmul.msk.bf16.vlgmr.msrb.gmra.mxu2 %vm697_vm2, %v1072_v40  ;;  %2135 = vmatmul.msk.bf16.vlgmr.msra.gmra.mxu3 %vm697_vm2, %v1072_v40 }
 0x61b   : > { %2136 = vmatmul.msk.bf16.vlgmr.msrb.gmra.mxu0 %vm697_vm2, %v1072_v40 }
 0x61f   : > { %v1193_v10 = vpop.permute.xlu1 %1192 }
 0x62b   : > { %2141 = vmatmul.msk.bf16.vlgmr.msra.gmra.mxu0 %vm697_vm2, %v1193_v10 }
 0x688   : > { %v1044_v43 = vpop.f32.mrf.mxu0 }
 0x689   : > { %v1048_v44 = vpack.c.bf16 %v1044_v43, %v1044_v43 }
 0x68b   : > { %2133 = vmatmul.msk.bf16.vlgmr.msrb.gmra.mxu1 %vm697_vm2, %v1048_v44 }
 0x690   : > { %v1046_v45 = vpop.f32.mrf.mxu0 }
 0x691   : > { %v2146_v45 = vld [vmem:[%s2996_s17 + $0x8] sm:$0x3] }
 0x698   : > { %v1111_v46 = vpop.f32.mrf.mxu0 }
 0x699   : > { %v1149_v47 = vpack.c.bf16 %v1111_v46, %v1111_v46  ;;  %v1297_v46 = vsel %vm701_vm1, %v2146_v45, 0 }
 0x69b   : > { %v1154_v48 = vsel %vm789_vm4, %v1149_v47, 0  ;;  %v1085_v49 = vpop.f32.mrf.mxu2  ;;  %v1098_v50 = vpop.f32.mrf.mxu3 }
 0x69c   : > { %v1116_v51 = vpack.c.bf16 %v1098_v50, %v1098_v50  ;;  %1163 = vmatpush.bf16.msra.mxu2 %v1154_v48  ;;  %v1115_v57 = vpack.c.bf16 %v1085_v49, %v1085_v49 }
 0x69e   : > { %v1121_v52 = vsel %vm697_vm2, %v1116_v51, 0 }
 0x69f   : > { %1130 = vmatpush.bf16.xpose.msra.mxu1 %v1121_v52 }
 0x6a0   : > { %1230 = vmatpush.bf16.msrb.mxu2 %v2702_v18  ;;  %v1113_v53 = vpop.f32.mrf.mxu0 }
 0x6a3   : > { %v1087_v54 = vpop.f32.mrf.mxu2  ;;  %v1100_v55 = vpop.f32.mrf.mxu3 }
 0x6a6   : > { %2137 = vmatmul.msk.bf16.vlgmr.msra.gmra.mxu1 %vm697_vm2, %v1115_v57 }
 0x6a7   : > { %1217 = vmatpush.bf16.msrb.mxu1 %v2679_v3 }
 0x6a8   : > { %v1206_v17 = vpop.f32.mrf.mxu0 }
 0x6a9   : > { %v1236_v28 = vpack.c.bf16 %v1206_v17, %v1206_v17 }
 0x6ab   : > { %1306 = vmatpush.bf16.msra.mxu1 %v1297_v46 }
 0x6b0   : > { %v1208_v22 = vpop.f32.mrf.mxu0 }
 0x6b6   : > { %2142 = vmatmul.msk.bf16.vlgmr.msrb.gmra.mxu1 %vm697_vm2, %v1193_v10 }
 0x708   : > { %v1066_v59 = vpop.f32.mrf.mxu1 }
 0x709   : > { %v1070_v60 = vadd.f32 %v1066_v59, %v947_v58 }
 0x710   : > { %v1068_v61 = vpop.f32.mrf.mxu1 }
 0x723   : > { %v1132_v62 = vpop.f32.mrf.mxu1 }
 0x724   : > { %v1136_v63 = vmul.f32 0.5, %v1132_v62 }
 0x726   : > { %v1137_v0 = vsel %vm772_vm3, %v1136_v63, -inf }
 0x727   : > { %1138 = vmax.xlane.f32.xlu2 %v1137_v0 }
 0x72b   : > { %v1134_v1 = vpop.f32.mrf.mxu1 }
 0x733   : > { %v1219_v19 = vpop.f32.mrf.mxu1 }
 0x734   : > { %v1237_v20 = vpack.c.bf16 %v1219_v19, %v1219_v19  ;;  %v2153_v19 = vld [vmem:[%s2996_s17 + $0xa] sm:$0x3] }
 0x736   : > { %v1242_v21 = vsel %vm697_vm2, %v1237_v20, 0  ;;  %v1418_v20 = vsel %vm701_vm1, %v2153_v19, 0 }
 0x737   : > { %1251 = vmatpush.bf16.xpose.msra.mxu3 %v1242_v21 }
 0x73b   : > { %v1221_v23 = vpop.f32.mrf.mxu1 }
 0x79a   : > { %v1139_v4 = vpop.xlane.xlu2 %1138 }
 0x79b   : > { %v1140_v5 = vsub.f32 %v1136_v63, %v1139_v4 }
 0x79d   : > { %v1141_v7 = vmul.f32 1.442695, %v1140_v5 }
 0x79f   : > { %2325 = vpow2.f32 %v1141_v7 }
 0x7a5   : > { %v2326_v9 = vpop.eup %2325 }
 0x7a6   : > { %v1143_v56 = vsel %vm772_vm3, %v2326_v9, 0.0 }
 0x7a7   : > { %1144 = vadd.xlane.f32.xlu0 %v1143_v56 }
 0x81a   : > { %v1145_v13 = vpop.xlane.xlu0 %1144 }
 0x81b   : > { %2327 = vrcp.f32 %v1145_v13 }
 0x821   : > { %v2328_v14 = vpop.eup %2327 }
 0x822   : > { %v1147_v15 = vmul.f32 %v2328_v14, %v2326_v9 }
 0x824   : > { %v1148_v16 = vpack.c.bf16 %v1147_v15, %v1147_v15 }
 0x826   : > { %2138 = vmatmul.msk.bf16.vlgmr.msra.gmra.mxu2 %vm772_vm3, %v1148_v16 }
 0x827   : > { %1325 = vmatpush.bf16.msra.mxu2 %v2685_v6 }
 0x836   : > { %2143 = vmatmul.msk.bf16.vlgmr.msrb.gmra.mxu2 %vm697_vm2, %v1193_v10 }
 0x8a9   : > { %v1165_v24 = vpop.f32.mrf.mxu2 }
 0x8aa   : > { %v1169_v25 = vpack.c.bf16 %v1165_v24, %v1165_v24 }
 0x8ac   : > { %2140 = vmatmul.msk.bf16.vlgmr.msrb.gmra.mxu3 %vm697_vm2, %v1169_v25 }
 0x8ad   : > { %1338 = vmatpush.bf16.msrb.mxu3 %v2679_v3 }
 0x8b1   : > { %v1167_v26 = vpop.f32.mrf.mxu2 }
 0x8b9   : > { %v1232_v27 = vpop.f32.mrf.mxu2 }
 0x8ba   : > { %v1270_v29 = vpack.c.bf16 %v1232_v27, %v1232_v27 }
 0x8bc   : > { %v1275_v30 = vsel %vm789_vm4, %v1270_v29, 0  ;;  %2144 = vmatmul.msk.bf16.vlgmr.msra.gmra.mxu3 %vm697_vm2, %v1236_v28 }
 0x8bd   : > { %1284 = vmatpush.bf16.msrb.mxu0 %v1275_v30  ;;  %1427 = vmatpush.bf16.msra.mxu3 %v1418_v20 }
 0x8c1   : > { %1351 = vmatpush.bf16.msra.mxu0 %v2702_v18  ;;  %v1234_v31 = vpop.f32.mrf.mxu2 }
 0x92f   : > { %v1187_v32 = vpop.f32.mrf.mxu3 }
 0x930   : > { %v1191_v33 = vadd.f32 %v1187_v32, %v1070_v60 }
 0x937   : > { %v1189_v34 = vpop.f32.mrf.mxu3 }
 0x93f   : > { %v1253_v35 = vpop.f32.mrf.mxu3 }
 0x940   : > { %v1257_v36 = vmul.f32 0.5, %v1253_v35 }
 0x942   : > { %v1258_v37 = vsel %vm772_vm3, %v1257_v36, -inf }
 0x943   : > { %1259 = vmax.xlane.f32.xlu0 %v1258_v37 }
 0x947   : > { %v1255_v38 = vpop.f32.mrf.mxu3 }
 0x957   : > { %1313 = vrot.lane.b32.xlu0 %v2691_v8, %s2451_s13 }
 0x95f   : > { %1434 = vrot.lane.b32.xlu0 %v2691_v8, %s2452_s16 }
 0x9b6   : > { %v1260_v39 = vpop.xlane.xlu0 %1259 }
 0x9b7   : > { %v1261_v40 = vsub.f32 %v1257_v36, %v1260_v39 }
 0x9b9   : > { %v1262_v41 = vmul.f32 1.442695, %v1261_v40 }
 0x9bb   : > { %2329 = vpow2.f32 %v1262_v41 }
 0x9c1   : > { %v2330_v42 = vpop.eup %2329 }
 0x9c2   : > { %v1264_v43 = vsel %vm772_vm3, %v2330_v42, 0.0 }
 0x9c3   : > { %1265 = vadd.xlane.f32.xlu1 %v1264_v43 }
 0x9c9   : > { %v1314_v44 = vpop.permute.xlu0 %1313 }
 0x9ca   : > { %2148 = vmatmul.msk.bf16.vlgmr.msra.gmra.mxu2 %vm697_vm2, %v1314_v44  ;;  %2149 = vmatmul.msk.bf16.vlgmr.msrb.gmra.mxu3 %vm697_vm2, %v1314_v44 }
 0x9d1   : > { %v1435_v17 = vpop.permute.xlu0 %1434 }
 0xa36   : > { %v1266_v47 = vpop.xlane.xlu1 %1265 }
 0xa37   : > { %2331 = vrcp.f32 %v1266_v47 }
 0xa3d   : > { %v2332_v48 = vpop.eup %2331 }
 0xa3e   : > { %v1268_v49 = vmul.f32 %v2332_v48, %v2330_v42 }
 0xa40   : > { %v1269_v50 = vpack.c.bf16 %v1268_v49, %v1268_v49  ;;  %v2160_v49 = vld [vmem:[%s2996_s17 + $0xc] sm:$0x3] }
 0xa42   : > { %2145 = vmatmul.msk.bf16.vlgmr.msrb.gmra.mxu0 %vm772_vm3, %v1269_v50  ;;  %v1539_v50 = vsel %vm701_vm1, %v2160_v49, 0 }
 0xa43   : > { %1446 = vmatpush.bf16.msrb.mxu0 %v2685_v6 }
 0xa4d   : > { %v1327_v51 = vpop.f32.mrf.mxu2  ;;  %v1340_v52 = vpop.f32.mrf.mxu3 }
 0xa4e   : > { %v1358_v53 = vpack.c.bf16 %v1340_v52, %v1340_v52  ;;  %v1357_v62 = vpack.c.bf16 %v1327_v51, %v1327_v51 }
 0xa50   : > { %v1363_v54 = vsel %vm697_vm2, %v1358_v53, 0 }
 0xa51   : > { %1372 = vmatpush.bf16.xpose.msrb.mxu1 %v1363_v54 }
 0xa52   : > { %2150 = vmatmul.msk.bf16.vlgmr.msra.gmra.mxu0 %vm697_vm2, %v1314_v44 }
 0xa55   : > { %v1329_v55 = vpop.f32.mrf.mxu2  ;;  %v1342_v57 = vpop.f32.mrf.mxu3 }
 0xa62   : > { %2155 = vmatmul.msk.bf16.vlgmr.msrb.gmra.mxu0 %vm697_vm2, %v1435_v17 }
 0xabf   : > { %v1286_v58 = vpop.f32.mrf.mxu0 }
 0xac0   : > { %v1290_v59 = vpack.c.bf16 %v1286_v58, %v1286_v58 }
 0xac2   : > { %2147 = vmatmul.msk.bf16.vlgmr.msra.gmra.mxu1 %vm697_vm2, %v1290_v59 }
 0xac3   : > { %1459 = vmatpush.bf16.msra.mxu1 %v2679_v3 }
 0xac7   : > { %v1288_v60 = vpop.f32.mrf.mxu0 }
 0xacf   : > { %v1353_v61 = vpop.f32.mrf.mxu0 }
 0xad0   : > { %v1391_v63 = vpack.c.bf16 %v1353_v61, %v1353_v61 }
 0xad2   : > { %v1396_v0 = vsel %vm789_vm4, %v1391_v63, 0  ;;  %2151 = vmatmul.msk.bf16.vlgmr.msrb.gmra.mxu1 %vm697_vm2, %v1357_v62 }
 0xad3   : > { %1405 = vmatpush.bf16.msrb.mxu2 %v1396_v0  ;;  %1548 = vmatpush.bf16.msrb.mxu1 %v1539_v50  ;;  %v2225_v50 = vld [vmem:[%s2661_s12 + $0x30] sm:$0xff] }
 0xad7   : > { %1472 = vmatpush.bf16.msra.mxu2 %v2702_v18  ;;  %v1355_v1 = vpop.f32.mrf.mxu0 }
 0xadf   : > { %v1448_v25 = vpop.f32.mrf.mxu0 }
 0xae0   : > { %v1478_v35 = vpack.c.bf16 %v1448_v25, %v1448_v25 }
 0xae2   : > { %2156 = vmatmul.msk.bf16.vlgmr.msra.gmra.mxu1 %vm697_vm2, %v1435_v17 }
 0xae7   : > { %v1450_v29 = vpop.f32.mrf.mxu0 }
 0xb3f   : > { %v1308_v4 = vpop.f32.mrf.mxu1 }
 0xb40   : > { %v1312_v5 = vadd.f32 %v1308_v4, %v1191_v33 }
 0xb47   : > { %v1310_v7 = vpop.f32.mrf.mxu1 }
 0xb4f   : > { %v1374_v9 = vpop.f32.mrf.mxu1 }
 0xb50   : > { %v1378_v56 = vmul.f32 0.5, %v1374_v9 }
 0xb52   : > { %v1379_v10 = vsel %vm772_vm3, %v1378_v56, -inf }
 0xb53   : > { %1380 = vmax.xlane.f32.xlu2 %v1379_v10 }
 0xb57   : > { %v1376_v11 = vpop.f32.mrf.mxu1 }
 0xb5f   : > { %v1461_v26 = vpop.f32.mrf.mxu1 }
 0xb60   : > { %v1479_v27 = vpack.c.bf16 %v1461_v26, %v1461_v26 }
 0xb62   : > { %v1484_v28 = vsel %vm697_vm2, %v1479_v27, 0 }
 0xb63   : > { %1493 = vmatpush.bf16.xpose.msrb.mxu3 %v1484_v28 }
 0xb67   : > { %v1463_v30 = vpop.f32.mrf.mxu1 }
 0xb68   : > { %v2306_v30 = vld [vmem:[%s2997_s25] ss:$0 sm:$0xff]  ;;  %s3005_s25 = smov %s3004_s20 }
 0xbc6   : > { %v1381_v12 = vpop.xlane.xlu2 %1380 }
 0xbc7   : > { %v1382_v13 = vsub.f32 %v1378_v56, %v1381_v12 }
 0xbc9   : > { %v1383_v14 = vmul.f32 1.442695, %v1382_v13 }
 0xbcb   : > { %2333 = vpow2.f32 %v1383_v14 }
 0xbd1   : > { %v2334_v15 = vpop.eup %2333 }
 0xbd2   : > { %v1385_v16 = vsel %vm772_vm3, %v2334_v15, 0.0 }
 0xbd3   : > { %1386 = vadd.xlane.f32.xlu2 %v1385_v16 }
 0xc46   : > { %v1387_v21 = vpop.xlane.xlu2 %1386 }
 0xc47   : > { %2335 = vrcp.f32 %v1387_v21  ;;  %v2167_v21 = vld [vmem:[%s2996_s17 + $0xe] sm:$0x3] }
 0xc4d   : > { %v2336_v22 = vpop.eup %2335 }
 0xc4e   : > { %v1389_v23 = vmul.f32 %v2336_v22, %v2334_v15  ;;  %v1660_v22 = vsel %vm701_vm1, %v2167_v21, 0 }
 0xc50   : > { %v1390_v24 = vpack.c.bf16 %v1389_v23, %v1389_v23 }
 0xc52   : > { %2152 = vmatmul.msk.bf16.vlgmr.msrb.gmra.mxu2 %vm772_vm3, %v1390_v24 }
 0xc53   : > { %1567 = vmatpush.bf16.msrb.mxu2 %v2685_v6 }
 0xc62   : > { %2157 = vmatmul.msk.bf16.vlgmr.msra.gmra.mxu2 %vm697_vm2, %v1435_v17 }
 0xcd5   : > { %v1407_v31 = vpop.f32.mrf.mxu2 }
 0xcd6   : > { %v1411_v32 = vpack.c.bf16 %v1407_v31, %v1407_v31 }
 0xcd8   : > { %2154 = vmatmul.msk.bf16.vlgmr.msra.gmra.mxu3 %vm697_vm2, %v1411_v32 }
 0xcd9   : > { %1580 = vmatpush.bf16.msra.mxu3 %v2679_v3 }
 0xcdd   : > { %v1409_v33 = vpop.f32.mrf.mxu2 }
 0xce5   : > { %v1474_v34 = vpop.f32.mrf.mxu2 }
 0xce6   : > { %v1512_v6 = vpack.c.bf16 %v1474_v34, %v1474_v34 }
 0xce8   : > { %v1517_v36 = vsel %vm789_vm4, %v1512_v6, 0  ;;  %2158 = vmatmul.msk.bf16.vlgmr.msrb.gmra.mxu3 %vm697_vm2, %v1478_v35 }
 0xce9   : > { %1526 = vmatpush.bf16.msra.mxu0 %v1517_v36  ;;  %1669 = vmatpush.bf16.msrb.mxu3 %v1660_v22  ;;  %v2454_v36 = vmov 32.0  }
 0xced   : > { %1593 = vmatpush.bf16.msrb.mxu0 %v2702_v18  ;;  %v1476_v37 = vpop.f32.mrf.mxu2 }
 0xd5b   : > { %v1429_v38 = vpop.f32.mrf.mxu3 }
 0xd5c   : > { %v1433_v39 = vadd.f32 %v1429_v38, %v1312_v5 }
 0xd63   : > { %v1431_v40 = vpop.f32.mrf.mxu3 }
 0xd6b   : > { %v1495_v41 = vpop.f32.mrf.mxu3 }
 0xd6c   : > { %v1499_v42 = vmul.f32 0.5, %v1495_v41 }
 0xd6e   : > { %v1500_v3 = vsel %vm772_vm3, %v1499_v42, -inf }
 0xd6f   : > { %1501 = vmax.xlane.f32.xlu2 %v1500_v3 }
 0xd73   : > { %v1497_v43 = vpop.f32.mrf.mxu3 }
 0xd87   : > { %1555 = vrot.lane.b32.xlu2 %v2691_v8, %s2453_s1 }
 0xde2   : > { %v1502_v44 = vpop.xlane.xlu2 %1501 }
 0xde3   : > { %v1503_v45 = vsub.f32 %v1499_v42, %v1502_v44 }
 0xde5   : > { %v1504_v46 = vmul.f32 1.442695, %v1503_v45 }
 0xde7   : > { %2337 = vpow2.f32 %v1504_v46  ;;  %v2218_v46 = vld [vmem:[%s2647_s24 + $0x8] sm:$0xff] }
 0xdea   : > { %v1556_v48 = vpop.permute.xlu2 %1555 }
 0xdeb   : > { %2162 = vmatmul.msk.bf16.vlgmr.msrb.gmra.mxu2 %vm697_vm2, %v1556_v48  ;;  %2163 = vmatmul.msk.bf16.vlgmr.msra.gmra.mxu3 %vm697_vm2, %v1556_v48 }
 0xded   : > { %v2338_v47 = vpop.eup %2337 }
 0xdee   : > { %v1506_v18 = vsel %vm772_vm3, %v2338_v47, 0.0 }
 0xdef   : > { %1507 = vadd.xlane.f32.xlu0 %v1506_v18  ;;  %v2226_v18 = vld [vmem:[%s2661_s12 + $0x38] sm:$0xff] }
 0xe62   : > { %v1508_v51 = vpop.xlane.xlu0 %1507 }
 0xe63   : > { %2339 = vrcp.f32 %v1508_v51 }
 0xe69   : > { %v2340_v8 = vpop.eup %2339 }
 0xe6a   : > { %v1510_v52 = vmul.f32 %v2340_v8, %v2338_v47  ;;  %v2217_v47 = vld [vmem:[%s2647_s24] sm:$0xff]  ;;  %v2224_v8 = vld [vmem:[%s2661_s12 + $0x28] sm:$0xff] }
 0xe6c   : > { %v1511_v53 = vpack.c.bf16 %v1510_v52, %v1510_v52  ;;  %v2223_v52 = vld [vmem:[%s2661_s12 + $0x20] sm:$0xff] }
 0xe6e   : > { %2159 = vmatmul.msk.bf16.vlgmr.msra.gmra.mxu0 %vm772_vm3, %v1511_v53  ;;  %v1569_v54 = vpop.f32.mrf.mxu2  ;;  %v1582_v55 = vpop.f32.mrf.mxu3 }
 0xe6f   : > { %v1600_v57 = vpack.c.bf16 %v1582_v55, %v1582_v55  ;;  %v1599_v1 = vpack.c.bf16 %v1569_v54, %v1569_v54  ;;  %1752 = vmatpush.bf16.msra.mxu0 %v2218_v46  ;;  %v2222_v55 = vld [vmem:[%s2661_s12 + $0x18] sm:$0xff] }
 0xe71   : > { %v1605_v58 = vsel %vm697_vm2, %v1600_v57, 0 }
 0xe72   : > { %1614 = vmatpush.bf16.xpose.msra.mxu1 %v1605_v58 }
 0xe73   : > { %1753 = vmatpush.bf16.msra.mxu0 %v2217_v47 }
 0xe76   : > { %v1571_v59 = vpop.f32.mrf.mxu2  ;;  %v1584_v60 = vpop.f32.mrf.mxu3 }
 0xe77   : > { %v2221_v59 = vld [vmem:[%s2661_s12 + $0x10] sm:$0xff] }
 0xe7e   : > { %2164 = vmatmul.msk.bf16.vlgmr.msrb.gmra.mxu0 %vm697_vm2, %v1556_v48 }
 0xeeb   : > { %v1528_v61 = vpop.f32.mrf.mxu0 }
 0xeec   : > { %v1532_v62 = vpack.c.bf16 %v1528_v61, %v1528_v61 }
 0xeee   : > { %2161 = vmatmul.msk.bf16.vlgmr.msrb.gmra.mxu1 %vm697_vm2, %v1532_v62  ;;  %v2307_v62 = vld [vmem:[%s2998_s18] ss:$0 sm:$0xff] }
 0xeef   : > { %1829 = vmatpush.bf16.msrb.mxu1 %v2226_v18 }
 0xef3   : > { %v1530_v63 = vpop.f32.mrf.mxu0  ;;  %1830 = vmatpush.bf16.msrb.mxu1 %v2225_v50 }
 0xef7   : > { %1831 = vmatpush.bf16.msrb.mxu1 %v2224_v8 }
 0xefb   : > { %v1595_v0 = vpop.f32.mrf.mxu0  ;;  %1832 = vmatpush.bf16.msrb.mxu1 %v2223_v52 }
 0xefc   : > { %v1633_v4 = vpack.c.bf16 %v1595_v0, %v1595_v0  ;;  %v2308_v0 = vld [vmem:[%s3000_s14] ss:$0 sm:$0xff] }
 0xefe   : > { %v1638_v5 = vsel %vm789_vm4, %v1633_v4, 0  ;;  %2165 = vmatmul.msk.bf16.vlgmr.msra.gmra.mxu1 %vm697_vm2, %v1599_v1 }
 0xeff   : > { %1647 = vmatpush.bf16.msra.mxu2 %v1638_v5  ;;  %1833 = vmatpush.bf16.msrb.mxu1 %v2222_v55 }
 0xf03   : > { %v1597_v7 = vpop.f32.mrf.mxu0  ;;  %1834 = vmatpush.bf16.msrb.mxu1 %v2221_v59 }
 0xf6b   : > { %v1550_v9 = vpop.f32.mrf.mxu1 }
 0xf6c   : > { %v1554_v56 = vadd.f32 %v1550_v9, %v1433_v39  ;;  %v2220_v9 = vld [vmem:[%s2661_s12 + $0x8] sm:$0xff] }
 0xf6d   : > { %1835 = vmatpush.bf16.msrb.mxu1 %v2220_v9 }
 0xf73   : > { %v1552_v10 = vpop.f32.mrf.mxu1 }
 0xf74   : > { %v2309_v10 = vld [vmem:[%s669_s4] ss:$0 sm:$0xff]  ;;  %s3001_s4 = sld [smem:[#allocation9_spill]] }
 0xf7b   : > { %v1616_v11 = vpop.f32.mrf.mxu1 }
 0xf7c   : > { %v1620_v12 = vmul.f32 0.5, %v1616_v11 }
 0xf7e   : > { %v1621_v13 = vsel %vm772_vm3, %v1620_v12, -inf }
 0xf7f   : > { %1622 = vmax.xlane.f32.xlu1 %v1621_v13 }
 0xf83   : > { %v1618_v14 = vpop.f32.mrf.mxu1 }
 0xff2   : > { %v1623_v15 = vpop.xlane.xlu1 %1622 }
 0xff3   : > { %v1624_v16 = vsub.f32 %v1620_v12, %v1623_v15 }
 0xff5   : > { %v1625_v17 = vmul.f32 1.442695, %v1624_v16  ;;  %v2310_v16 = vld [vmem:[%s677_s15] ss:$0 sm:$0xff]  ;;  %s3002_s15 = sld [smem:[#allocation6_spill]] }
 0xff7   : > { %2341 = vpow2.f32 %v1625_v17 }
 0xffd   : > { %v2342_v19 = vpop.eup %2341 }
 0xffe   : > { %v1627_v20 = vsel %vm772_vm3, %v2342_v19, 0.0 }
 0xfff   : > { %1628 = vadd.xlane.f32.xlu1 %v1627_v20 }
0x1072   : > { %v1629_v23 = vpop.xlane.xlu1 %1628 }
0x1073   : > { %2343 = vrcp.f32 %v1629_v23 }
0x1074   : > { %2345 = vrcp.f32 %v2454_v36  ;;  %v2311_v36 = vld [vmem:[%s680_s30] ss:$0 sm:$0xff]  ;;  %s3008_s30 = sand.u32 1, %s3002_s15  }
0x1075   : > { %s1877_s29 = scalar_lea.sflag [#allocation3], %s3008_s30 }
0x1079   : > { %v2344_v24 = vpop.eup %2343 }
0x107a   : > { %v1631_v25 = vmul.f32 %v2344_v24, %v2342_v19  ;;  %v2346_v37 = vpop.eup %2345 }
0x107b   : > { %v1689_v38 = vmul.f32 32.0, %v2346_v37  ;;  %vm1693_vm6 = vweird.f32 %v2346_v37 }
0x107c   : > { %v1632_v26 = vpack.c.bf16 %v1631_v25, %v1631_v25 }
0x107d   : > { %v1690_v39 = vsub.f32 1.0, %v1689_v38 }
0x107e   : > { %2166 = vmatmul.msk.bf16.vlgmr.msra.gmra.mxu2 %vm772_vm3, %v1632_v26 }
0x107f   : > { %v1691_v40 = vmul.f32 %v2346_v37, %v1690_v39  ;;  %v2312_v39 = vld [vmem:[%s683_s7] ss:$0 sm:$0xff]  ;;  %s2371_s7 = scalar_lea.hbm %s3005_s25, 16 }
0x1081   : > { %v1692_v41 = vadd.f32 %v2346_v37, %v1691_v40 }
0x1083   : > { %v2833_v42 = vsel %vm1693_vm6, %v2346_v37, %v1692_v41 }
0x1101   : > { %v1649_v27 = vpop.f32.mrf.mxu2 }
0x1102   : > { %v1653_v28 = vpack.c.bf16 %v1649_v27, %v1649_v27 }
0x1104   : > { %2168 = vmatmul.msk.bf16.vlgmr.msrb.gmra.mxu3 %vm697_vm2, %v1653_v28 }
0x1109   : > { %v1651_v29 = vpop.f32.mrf.mxu2 }
0x1187   : > { %v1671_v31 = vpop.f32.mrf.mxu3 }
0x1188   : > { %v1675_v32 = vadd.f32 %v1671_v31, %v1554_v56  ;;  %v2219_v56 = vld [vmem:[%s2661_s12] sm:$0xff]  ;;  %s2211_s12 = sshll.u32 %s3001_s4, 3 }
0x1189   : > { %1836 = vmatpush.bf16.msrb.mxu1 %v2219_v56  ;;  %s1887_s24 = scalar_lea.hbm %s3004_s20, %s2211_s12 }
0x118a   : > { %v1680_v33 = vadd.f32 %v2306_v30, %v1675_v32  ;;  %s1891_s14 = sshll.u32 %s1887_s24, 4  ;;  %s1892_s14 = int_to_ptr.hbm [resolvable:$true] %s1891_s14 }
0x118b   : > { %s2365_s17 = sshra.s32 %s1892_s14, 4  ;;  %s2366_s17 = int_to_ptr.hbm [resolvable:$true] %s2365_s17 }
0x118c   : > { %v1681_v34 = vadd.f32 %v1680_v33, %v2676_v2  ;;  %s2367_s19 = scalar_lea.hbm %s2366_s17, 8  ;;  %p2372_p5 = scmp.lt.s32.totalorder %s2366_s17, %s3005_s25 }
0x118d   : > { %p2368_p1 = scmp.ne.s32.totalorder %s2366_s17, %s2367_s19  ;;  %p2373_p6 = scmp.lt.s32.totalorder %s2371_s7, %s2367_s19 }
0x118e   : > { %v1685_v35 = vsel %vm1684_vm5, %v1681_v34, 0.0 }
0x118f   : > { %1686 = vadd.xlane.f32.xlu2 %v1685_v35  ;;  %v1673_v6 = vpop.f32.mrf.mxu3  ;;  %p2369_p2 = pnand %p2368_p1, %p2579_p3  ;;  %p2374_p7 = por %p2373_p6, %p2372_p5 }
0x1191   : > { %p2370_p4 = pneg %p2369_p2 }
0x1193   : > { %p2375_p8 = pnand %p2374_p7, %p2370_p4 }
0x1202   : > { %v1687_v3 = vpop.xlane.xlu2 %1686 }
0x1203   : > { %v1695_v2 = vmul.f32 %v2833_v42, %v1687_v3 }
0x1205   : > { %v1696_v43 = vsub.f32 %v1681_v34, %v1695_v2 }
0x1207   : > { %v1697_v44 = vmul.f32 %v1696_v43, %v1696_v43 }
0x1209   : > { %v1698_v45 = vsel %vm1684_vm5, %v1697_v44, 0.0 }
0x120a   : > { %1699 = vadd.xlane.f32.xlu1 %v1698_v45 }
0x127d   : > { %v1700_v48 = vpop.xlane.xlu1 %1699 }
0x127e   : > { %v1701_v49 = vmul.f32 %v1700_v48, %v2833_v42 }
0x1280   : > { %v1702_v51 = vadd.f32 1e-05, %v1701_v49 }
0x1282   : > { %2347 = vrsqrt.f32 %v1702_v51  ;;  %vm1709_vm8 = vweird.f32 %v1702_v51 }
0x1288   : > { %v2348_v53 = vpop.eup %2347 }
0x1289   : > { %v1704_v54 = vmul.f32 %v2348_v53, %v1702_v51  ;;  %vm1710_vm7 = vweird.f32 %v2348_v53 }
0x128a   : > { %vm1711_vm9 = vmor %vm1709_vm8, %vm1710_vm7 }
0x128b   : > { %v1705_v57 = vmul.f32 %v2348_v53, %v1704_v54 }
0x128d   : > { %v1706_v58 = vmul.f32 0.5, %v1705_v57 }
0x128f   : > { %v1707_v60 = vsub.f32 1.5, %v1706_v58 }
0x1291   : > { %v1708_v61 = vmul.f32 %v2348_v53, %v1707_v60 }
0x1293   : > { %v1712_v63 = vsel %vm1711_vm9, %v2348_v53, %v1708_v61 }
0x1294   : > { %v1713_v1 = vmul.f32 %v1712_v63, %v1696_v43 }
0x1296   : > { %v1717_v4 = vmul.f32 %v2307_v62, %v1713_v1 }
0x1298   : > { %v1721_v5 = vadd.f32 %v2308_v0, %v1717_v4 }
0x129a   : > { %v1722_v7 = vpack.c.bf16 %v1721_v5, %v1721_v5 }
0x129c   : > { %2177 = vmatmul.msk.bf16.vlgmr.msra.gmra.mxu0 %vm1684_vm5, %v1722_v7 }
0x1319   : > { %v1755_v11 = vpop.f32.mrf.mxu0 }
0x131a   : > { %v1756_v12 = vadd.f32 %v2309_v10, %v1755_v11 }
0x131c   : > { %v1759_v13 = vmax.f32 %v1756_v12, 0.0 }
0x131e   : > { %v1760_v14 = vpack.c.bf16 %v1759_v13, %v1759_v13 }
0x1320   : > { %1837 = vmatmul.bf16.vlgmr.msrb.gmra.mxu1 %v1760_v14 }
0x1321   : > { %v1757_v15 = vpop.f32.mrf.mxu0 }
0x139d   : > { %v1838_v17 = vpop.f32.mrf.mxu1 }
0x139e   : > { %v1839_v19 = vadd.f32 %v2310_v16, %v1838_v17 }
0x13a0   : > { %v1842_v20 = vadd.f32 %v1839_v19, %v1721_v5 }
0x13a2   : > { %v1845_v21 = vsel %vm1684_vm5, %v1842_v20, 0.0 }
0x13a3   : > { %1846 = vadd.xlane.f32.xlu1 %v1845_v21 }
0x13a5   : > { %v1840_v22 = vpop.f32.mrf.mxu1 }
0x1416   : > { %v1847_v23 = vpop.xlane.xlu1 %1846 }
0x1417   : > { %v1848_v24 = vmul.f32 %v1847_v23, %v2833_v42 }
0x1419   : > { %v1849_v25 = vsub.f32 %v1842_v20, %v1848_v24 }
0x141b   : > { %v1850_v26 = vmul.f32 %v1849_v25, %v1849_v25 }
0x141d   : > { %v1851_v27 = vsel %vm1684_vm5, %v1850_v26, 0.0 }
0x141e   : > { %1852 = vadd.xlane.f32.xlu0 %v1851_v27 }
0x1491   : > { %v1853_v28 = vpop.xlane.xlu0 %1852 }
0x1492   : > { %v1854_v29 = vmul.f32 %v1853_v28, %v2833_v42 }
0x1494   : > { %v1855_v30 = vadd.f32 1e-05, %v1854_v29 }
0x1496   : > { %2349 = vrsqrt.f32 %v1855_v30  ;;  %vm1862_vm11 = vweird.f32 %v1855_v30 }
0x149c   : > { %v2350_v31 = vpop.eup %2349 }
0x149d   : > { %v1857_v32 = vmul.f32 %v2350_v31, %v1855_v30  ;;  %vm1863_vm10 = vweird.f32 %v2350_v31 }
0x149e   : > { %vm1864_vm12 = vmor %vm1862_vm11, %vm1863_vm10 }
0x149f   : > { %v1858_v33 = vmul.f32 %v2350_v31, %v1857_v32 }
0x14a1   : > { %v1859_v34 = vmul.f32 0.5, %v1858_v33 }
0x14a3   : > { %v1860_v35 = vsub.f32 1.5, %v1859_v34 }
0x14a5   : > { %v1861_v6 = vmul.f32 %v2350_v31, %v1860_v35 }
0x14a7   : > { %v1865_v37 = vsel %vm1864_vm12, %v2350_v31, %v1861_v6 }
0x14a8   : > { %v1866_v38 = vmul.f32 %v1865_v37, %v1849_v25 }
0x14aa   : > { %v1870_v40 = vmul.f32 %v2311_v36, %v1866_v38 }
0x14ac   : > { %v1874_v41 = vadd.f32 %v2312_v39, %v1870_v40 }
0x14ae   : > { %1875 = vst.msk [vmem:[%s2671_s0] sm:$0xff] %vm1684_vm5, %v1874_v41 }
0x14af   : > { %2378 = shalt.err (!%p2375_p8)
}
0x14b0   : > { %2227 = dma.vmem_to_hbm [thread:$0]  (%p2579_p3), %s1890_s8, 128, %s1892_s14, %s1877_s29  }
0x14b1 PF: > { %s3009_s0 = sld [smem:[#allocation12_spill]] }
0x14b2   : > { %s3010_s15 = sld [smem:[#allocation5_spill]] }
0x14b7   : > { %p2233_p10 = scmp.ge.s32.totalorder %s3009_s0, 2 }
0x14b8   : > { %s1903_s13 = sand.u32 1, %s3010_s15  }
0x14b9   : > { %p2230_p11 = pnand %p2233_p10, %p2589_p9  ;;  %s1904_s16 = scalar_lea.sflag [#allocation3], %s1903_s13 }
0x14bb   : > { %p2231_p12 = pneg %p2230_p11 }
0x14bd   : > { %2412 = dma.done.wait (%p2231_p12), %s1904_s16, 128  }
0x14be   : > { %2414 = vsyncadd (%p2231_p12), %s1904_s16, 4294967168  ;;  %s27_s20 = sadd.s32 1, %s3009_s0   ;;  %s3012_s29 = sld [smem:[#allocation6_spill]] }
0x14bf   : > { %p24_p13 = scmp.ge.s32.totalorder %s27_s20, 6   ;;  %s3013_s30 = sld [smem:[#allocation7_spill]] }
0x14c0   : > { %s3014_s15 = sld [smem:[#allocation17_spill]] }
0x14c1   : > { %s3015_s16 = sld [smem:[#allocation10_spill]]  ;;  %26 = sbr.rel (!%p24_p13) target bundleno = 15 (0xf), region = 161 }
0x14c2   : > { %s3016_s17 = sld [smem:[#allocation11_spill]] }
0x14c3   : > { %s3017_s18 = sld [smem:[#allocation13_spill]] }
0x14c4   : > { %s3018_s19 = sld [smem:[#allocation15_spill]] }
0x14c6   :  { %1910 = vsyncpa [#allocation3], 1 }
0x14c7   :  { %1912 = vsyncpa [#allocation3 + $0x1], 1 }

</bundles_post_ra>
